<compile_context>
chip_gen: v6e
topology: v6e:2x2x1
jax: 0.10.0
libtpu: 0.0.40
codegen_flags: <defaults>
</compile_context>

<pallas_src>
import functools

import jax
import jax.numpy as jnp
import numpy as np
from jax.experimental import pallas as pl
from jax.experimental.pallas import tpu as pltpu

_NEG_SLOPE = 0.01   # nn.LeakyReLU() default
_EPS = 1e-5         # nn.InstanceNorm2d default


def unet_up_kernel(xp_ref, w_ref, skip_ref, out_ref, acc_ref):
    # xp_ref   : (1, H+2, W+2, Cin)        zero-padded input (compute dtype)
    # w_ref    : (4, 4*Cin, Cout)          fused taps, index = 2*p + q
    # skip_ref : (1, H, 2, W, 2*Cs)        skip, parity-split (contiguous) layout
    # out_ref  : (1, H, 2, W, 2*(Cout+Cs)) same layout for the output (bf16)
    # acc_ref  : (4, H*W, Cout) f32        pre-normalization conv result scratch
    _, hp2, wp2, cin = xp_ref.shape
    H, W = hp2 - 2, wp2 - 2
    cout = w_ref.shape[2]
    cs = skip_ref.shape[4] // 2
    ctot = cout + cs

    xp = xp_ref[0]  # (H+2, W+2, Cin)

    # 9 shifted windows of the padded input (each reused by up to 4 parities).
    win = {}
    for s in (0, 1, 2):
        for t in (0, 1, 2):
            win[(s, t)] = xp[s:s + H, t:t + W, :].reshape(H * W, cin)

    # ---- Pass 1: transposed conv, one output parity (p, q) at a time.
    #      Large Cin: one fused K=4*Cin matmul (fills the MXU K dim).
    #      Small Cin: 4 accumulating K=Cin matmuls, skipping the lhs concat.
    s_sum = jnp.zeros((1, cout), jnp.float32)
    taps = ((0, 0), (0, 1), (1, 0), (1, 1))
    for p in (0, 1):
        for q in (0, 1):
            idx = 2 * p + q
            if cin >= 64:
                lhs = jnp.concatenate(
                    [win[(p + dr, q + dc)] for dr, dc in taps], axis=-1)
                y = jnp.dot(lhs, w_ref[idx],
                            preferred_element_type=jnp.float32)   # (H*W, Cout)
            else:
                wk = w_ref[idx]                                    # (4*Cin, Cout)
                y = jnp.zeros((H * W, cout), jnp.float32)
                for t, (dr, dc) in enumerate(taps):
                    y = y + jnp.dot(win[(p + dr, q + dc)],
                                    wk[t * cin:(t + 1) * cin, :],
                                    preferred_element_type=jnp.float32)
            s_sum = s_sum + y.sum(axis=0, keepdims=True)
            acc_ref[idx] = y

    # ---- InstanceNorm2d stats (affine=False, biased variance) over 2H*2W.
    cnt = jnp.float32(4 * H * W)
    mean = s_sum / cnt                                             # (1, Cout)

    # Pass 2a: variance from centered values (no E[y^2]-mean^2 cancellation).
    s_sq = jnp.zeros((1, cout), jnp.float32)
    for idx in range(4):
        d = acc_ref[idx] - mean
        s_sq = s_sq + (d * d).sum(axis=0, keepdims=True)
    inv = jax.lax.rsqrt(s_sq / cnt + _EPS)                         # (1, Cout)

    # ---- Pass 2b: normalize + LeakyReLU, assemble the full channel row for
    #      each output parity p and issue ONE full-width store per p.
    for p in (0, 1):
        sk = skip_ref[0, :, p, :, :]                               # (H, W, 2*Cs)
        parts = []
        for q in (0, 1):
            y = (acc_ref[2 * p + q] - mean) * inv
            y = jnp.where(y >= 0, y, _NEG_SLOPE * y)
            parts.append(y.reshape(H, W, cout).astype(out_ref.dtype))
            parts.append(sk[:, :, q * cs:(q + 1) * cs])
        out_ref[0, :, p, :, :] = jnp.concatenate(parts, axis=-1)


def _pack_weight(w, compute_dtype):
    """w: (Cin, Cout, 4, 4) PyTorch ConvTranspose2d layout -> (4, 4*Cin, Cout)."""
    blocks = []
    for p in (0, 1):
        for q in (0, 1):
            parts = [w[:, :, 3 - p - 2 * dr, 3 - q - 2 * dc]
                     for dr in (0, 1) for dc in (0, 1)]
            blocks.append(jnp.concatenate(parts, axis=0))       # (4*Cin, Cout)
    return jnp.stack(blocks, axis=0).astype(compute_dtype)      # (4, 4*Cin, Cout)


def _vmem_cap_bytes():
    """Chip-aware VMEM cap (leave ~20% headroom below physical)."""
    try:
        phys = int(pltpu.get_tpu_info().vmem_capacity_bytes)
    except Exception:
        phys = 64 * 2 ** 20        # conservative (v7x-sized) fallback
    return max(32 * 2 ** 20, int(phys * 0.8))


_VMEM_CAP = _vmem_cap_bytes()


@functools.partial(jax.jit, static_argnames=("compute_dtype",))
def unet_up(x, skip, w, compute_dtype=jnp.bfloat16):
    """x: (N,H,W,Cin) NHWC, skip: (N,2H,2W,Cs) NHWC, w: (Cin,Cout,4,4) PyTorch layout."""
    N, H, W, cin = x.shape
    cout = w.shape[1]
    Hs, Ws, cs = skip.shape[1:]
    assert Hs == 2 * H and Ws == 2 * W
    ctot = cout + cs

    # Glue: pad+cast x (small), pack weight (tiny), cast + contiguous (free)
    # parity-split reshape of the skip tensor.
    xp = jnp.pad(x.astype(compute_dtype), ((0, 0), (1, 1), (1, 1), (0, 0)))
    w_pk = _pack_weight(w, compute_dtype)
    skip_r = skip.astype(compute_dtype).reshape(N, H, 2, W, 2 * cs)

    # VMEM budget: double-buffered pipeline blocks + f32 scratch + in-kernel
    # temporaries (window/concat/assembly copies are NOT views in Mosaic).
    csz = np.dtype(compute_dtype).itemsize
    blocks = (2 * (H + 2) * (W + 2) * cin * csz        # xp block, double buffered
              + 2 * 16 * cin * cout * csz              # packed weight
              + 2 * 4 * H * W * cs * csz               # skip block
              + 2 * 4 * H * W * ctot * csz)            # output block (bf16 now)
    scratch = 4 * H * W * cout * 4                     # f32 pre-norm conv scratch
    temps = (9 * H * W * cin * csz                     # materialized windows
             + 2 * 4 * H * W * cin * csz               # concatenated lhs copies
             + 3 * H * W * cout * 4                    # y / centered f32 temporaries
             + 2 * H * W * 2 * ctot * csz)             # assembled output rows
    need = blocks + scratch + temps + (4 << 20)        # + Mosaic internal headroom
    vmem_limit = int(min(_VMEM_CAP, max(32 * 2 ** 20, need)))

    out5 = pl.pallas_call(
        unet_up_kernel,
        out_shape=jax.ShapeDtypeStruct((N, H, 2, W, 2 * ctot), compute_dtype),
        grid=(N,),
        in_specs=[
            pl.BlockSpec((1, H + 2, W + 2, cin), lambda n: (n, 0, 0, 0)),
            pl.BlockSpec((4, 4 * cin, cout), lambda n: (0, 0, 0)),
            pl.BlockSpec((1, H, 2, W, 2 * cs), lambda n: (n, 0, 0, 0, 0)),
        ],
        out_specs=pl.BlockSpec((1, H, 2, W, 2 * ctot), lambda n: (n, 0, 0, 0, 0)),
        scratch_shapes=[pltpu.VMEM((4, H * W, cout), jnp.float32)],
        compiler_params=pltpu.CompilerParams(
            dimension_semantics=("parallel",),
            vmem_limit_bytes=vmem_limit,
        ),
    )(xp, w_pk, skip_r)

    # Contiguous (free) reshape back to NHWC (N, 2H, 2W, Cout+Cs).
    return out5.reshape(N, 2 * H, 2 * W, ctot)


def ref_unet_up(x, skip, w, compute_dtype=jnp.bfloat16):
    """Pure-JAX NHWC reference; conv operands cast like the kernel's MXU path."""
    N, H, W, cin = x.shape
    cout = w.shape[1]
    xc = x.astype(compute_dtype)
    wc = w.astype(compute_dtype)
    y = jnp.zeros((N, 2 * H + 2, 2 * W + 2, cout), jnp.float32)
    for kh in range(4):
        for kw in range(4):
            contrib = jnp.einsum("nhwc,cd->nhwd", xc, wc[:, :, kh, kw],
                                 preferred_element_type=jnp.float32)
            y = y.at[:, kh:kh + 2 * H:2, kw:kw + 2 * W:2, :].add(contrib)
    y = y[:, 1:2 * H + 1, 1:2 * W + 1, :]
    mean = y.mean(axis=(1, 2), keepdims=True)
    var = jnp.mean(jnp.square(y - mean), axis=(1, 2), keepdims=True)
    y = (y - mean) * jax.lax.rsqrt(var + _EPS)
    y = jnp.where(y >= 0, y, _NEG_SLOPE * y)
    return jnp.concatenate([y, skip], axis=-1)


if __name__ == "__main__":
    # Small shapes: N=2, in_channels=8, out_channels=8, input spatial 8x8
    # -> upsampled 16x16, skip has out_channels channels at 16x16.
    N, cin, cout, H, W = 2, 8, 8, 8, 8
    cs = cout

    key = jax.random.PRNGKey(0)
    kx, ks, kw = jax.random.split(key, 3)
    x = jax.random.normal(kx, (N, H, W, cin), jnp.float32)
    skip = jax.random.normal(ks, (N, 2 * H, 2 * W, cs), jnp.float32)
    # ConvTranspose2d weight in PyTorch layout (Cin, Cout, kH, kW), bias=False.
    w = 0.1 * jax.random.normal(kw, (cin, cout, 4, 4), jnp.float32)

    out = jax.block_until_ready(unet_up(x, skip, w))
    ref = jax.block_until_ready(ref_unet_up(x, skip, w))

    assert out.shape == (N, 2 * H, 2 * W, cout + cs)
    assert out.dtype == jnp.bfloat16
    np.testing.assert_allclose(np.asarray(out.astype(jnp.float32)),
                               np.asarray(ref),
                               rtol=2e-2, atol=2e-2)
    print("KERNEL_OK")
</pallas_src>

<mosaic_0001>
module attributes {stable_mosaic.version = 11 : i64} {
  func.func @unet_up_kernel(%arg0: i32, %arg1: memref<1x10x10x8xbf16, #tpu.memory_space<vmem>>, %arg2: memref<4x32x8xbf16, #tpu.memory_space<vmem>>, %arg3: memref<1x8x2x8x16xbf16, #tpu.memory_space<vmem>>, %arg4: memref<1x8x2x8x32xbf16, #tpu.memory_space<vmem>>, %arg5: memref<4x64x8xf32, #tpu.memory_space<vmem>>) attributes {dimension_semantics = [#tpu.dimension_semantics<parallel>], iteration_bounds = array<i64: 2>, scalar_prefetch = 0 : i64, scratch_operands = 1 : i64, tpu.core_type = #tpu.core_type<tc>, window_params = [{transform_indices = @transform_0, window_bounds = array<i64: 1, 10, 10, 8>}, {pipeline_mode = #tpu.pipeline_mode<synchronous>, transform_indices = @transform_1, window_bounds = array<i64: 4, 32, 8>}, {transform_indices = @transform_2, window_bounds = array<i64: 1, 8, 2, 8, 16>}, {transform_indices = @transform_3, window_bounds = array<i64: 1, 8, 2, 8, 32>}]} {
    %c0 = arith.constant 0 : index
    %c0_0 = arith.constant 0 : index
    %c0_1 = arith.constant 0 : index
    %c0_2 = arith.constant 0 : index
    %0 = vector.load %arg1[%c0, %c0_0, %c0_1, %c0_2] : memref<1x10x10x8xbf16, #tpu.memory_space<vmem>>, vector<1x10x10x8xbf16>
    %1 = vector.shape_cast %0 : vector<1x10x10x8xbf16> to vector<10x10x8xbf16>
    %2 = vector.extract_strided_slice %1 {offsets = [0, 0, 0], sizes = [8, 8, 8], strides = [1, 1, 1]} : vector<10x10x8xbf16> to vector<8x8x8xbf16>
    %3 = vector.shape_cast %2 : vector<8x8x8xbf16> to vector<64x8xbf16>
    %4 = vector.extract_strided_slice %1 {offsets = [0, 1, 0], sizes = [8, 8, 8], strides = [1, 1, 1]} : vector<10x10x8xbf16> to vector<8x8x8xbf16>
    %5 = vector.shape_cast %4 : vector<8x8x8xbf16> to vector<64x8xbf16>
    %6 = vector.extract_strided_slice %1 {offsets = [0, 2, 0], sizes = [8, 8, 8], strides = [1, 1, 1]} : vector<10x10x8xbf16> to vector<8x8x8xbf16>
    %7 = vector.shape_cast %6 : vector<8x8x8xbf16> to vector<64x8xbf16>
    %8 = vector.extract_strided_slice %1 {offsets = [1, 0, 0], sizes = [8, 8, 8], strides = [1, 1, 1]} : vector<10x10x8xbf16> to vector<8x8x8xbf16>
    %9 = vector.shape_cast %8 : vector<8x8x8xbf16> to vector<64x8xbf16>
    %10 = vector.extract_strided_slice %1 {offsets = [1, 1, 0], sizes = [8, 8, 8], strides = [1, 1, 1]} : vector<10x10x8xbf16> to vector<8x8x8xbf16>
    %11 = vector.shape_cast %10 : vector<8x8x8xbf16> to vector<64x8xbf16>
    %12 = vector.extract_strided_slice %1 {offsets = [1, 2, 0], sizes = [8, 8, 8], strides = [1, 1, 1]} : vector<10x10x8xbf16> to vector<8x8x8xbf16>
    %13 = vector.shape_cast %12 : vector<8x8x8xbf16> to vector<64x8xbf16>
    %14 = vector.extract_strided_slice %1 {offsets = [2, 0, 0], sizes = [8, 8, 8], strides = [1, 1, 1]} : vector<10x10x8xbf16> to vector<8x8x8xbf16>
    %15 = vector.shape_cast %14 : vector<8x8x8xbf16> to vector<64x8xbf16>
    %16 = vector.extract_strided_slice %1 {offsets = [2, 1, 0], sizes = [8, 8, 8], strides = [1, 1, 1]} : vector<10x10x8xbf16> to vector<8x8x8xbf16>
    %17 = vector.shape_cast %16 : vector<8x8x8xbf16> to vector<64x8xbf16>
    %18 = vector.extract_strided_slice %1 {offsets = [2, 2, 0], sizes = [8, 8, 8], strides = [1, 1, 1]} : vector<10x10x8xbf16> to vector<8x8x8xbf16>
    %19 = vector.shape_cast %18 : vector<8x8x8xbf16> to vector<64x8xbf16>
    %cst = arith.constant 0.000000e+00 : f32
    %20 = vector.broadcast %cst : f32 to vector<1x8xf32>
    %c0_3 = arith.constant 0 : index
    %c0_4 = arith.constant 0 : index
    %c0_5 = arith.constant 0 : index
    %21 = vector.load %arg2[%c0_3, %c0_4, %c0_5] : memref<4x32x8xbf16, #tpu.memory_space<vmem>>, vector<1x32x8xbf16>
    %22 = vector.shape_cast %21 : vector<1x32x8xbf16> to vector<32x8xbf16>
    %cst_6 = arith.constant 0.000000e+00 : f32
    %23 = vector.broadcast %cst_6 : f32 to vector<64x8xf32>
    %24 = vector.extract_strided_slice %22 {offsets = [0, 0], sizes = [8, 8], strides = [1, 1]} : vector<32x8xbf16> to vector<8x8xbf16>
    %cst_7 = arith.constant dense<0.000000e+00> : vector<64x8xf32>
    %25 = tpu.matmul %3, %24, %cst_7 {dimension_numbers = #tpu.dot_dimension_numbers<[1], [0], [0], [1], [0, 0, 1, 1], [], []>} : vector<64x8xbf16>, vector<8x8xbf16>, vector<64x8xf32> -> vector<64x8xf32>
    %26 = arith.addf %23, %25 : vector<64x8xf32>
    %27 = vector.extract_strided_slice %22 {offsets = [8, 0], sizes = [8, 8], strides = [1, 1]} : vector<32x8xbf16> to vector<8x8xbf16>
    %cst_8 = arith.constant dense<0.000000e+00> : vector<64x8xf32>
    %28 = tpu.matmul %5, %27, %cst_8 {dimension_numbers = #tpu.dot_dimension_numbers<[1], [0], [0], [1], [0, 0, 1, 1], [], []>} : vector<64x8xbf16>, vector<8x8xbf16>, vector<64x8xf32> -> vector<64x8xf32>
    %29 = arith.addf %26, %28 : vector<64x8xf32>
    %30 = vector.extract_strided_slice %22 {offsets = [16, 0], sizes = [8, 8], strides = [1, 1]} : vector<32x8xbf16> to vector<8x8xbf16>
    %cst_9 = arith.constant dense<0.000000e+00> : vector<64x8xf32>
    %31 = tpu.matmul %9, %30, %cst_9 {dimension_numbers = #tpu.dot_dimension_numbers<[1], [0], [0], [1], [0, 0, 1, 1], [], []>} : vector<64x8xbf16>, vector<8x8xbf16>, vector<64x8xf32> -> vector<64x8xf32>
    %32 = arith.addf %29, %31 : vector<64x8xf32>
    %33 = vector.extract_strided_slice %22 {offsets = [24, 0], sizes = [8, 8], strides = [1, 1]} : vector<32x8xbf16> to vector<8x8xbf16>
    %cst_10 = arith.constant dense<0.000000e+00> : vector<64x8xf32>
    %34 = tpu.matmul %11, %33, %cst_10 {dimension_numbers = #tpu.dot_dimension_numbers<[1], [0], [0], [1], [0, 0, 1, 1], [], []>} : vector<64x8xbf16>, vector<8x8xbf16>, vector<64x8xf32> -> vector<64x8xf32>
    %35 = arith.addf %32, %34 : vector<64x8xf32>
    %cst_11 = arith.constant dense<0.000000e+00> : vector<8xf32>
    %36 = vector.multi_reduction <add>, %35, %cst_11 [0] : vector<64x8xf32> to vector<8xf32>
    %37 = vector.shape_cast %36 : vector<8xf32> to vector<1x8xf32>
    %38 = arith.addf %20, %37 : vector<1x8xf32>
    %c0_12 = arith.constant 0 : index
    %c0_13 = arith.constant 0 : index
    %c0_14 = arith.constant 0 : index
    %39 = vector.load %arg5[%c0_12, %c0_13, %c0_14] : memref<4x64x8xf32, #tpu.memory_space<vmem>>, vector<1x64x8xf32>
    %40 = vector.shape_cast %39 : vector<1x64x8xf32> to vector<64x8xf32>
    %41 = vector.shape_cast %35 : vector<64x8xf32> to vector<1x64x8xf32>
    tpu.vector_store %arg5[%c0_12, %c0_13, %c0_14], %41 {strides = array<i32>} : memref<4x64x8xf32, #tpu.memory_space<vmem>>, vector<1x64x8xf32>,
    %c1 = arith.constant 1 : index
    %c0_15 = arith.constant 0 : index
    %c0_16 = arith.constant 0 : index
    %42 = vector.load %arg2[%c1, %c0_15, %c0_16] : memref<4x32x8xbf16, #tpu.memory_space<vmem>>, vector<1x32x8xbf16>
    %43 = vector.shape_cast %42 : vector<1x32x8xbf16> to vector<32x8xbf16>
    %cst_17 = arith.constant 0.000000e+00 : f32
    %44 = vector.broadcast %cst_17 : f32 to vector<64x8xf32>
    %45 = vector.extract_strided_slice %43 {offsets = [0, 0], sizes = [8, 8], strides = [1, 1]} : vector<32x8xbf16> to vector<8x8xbf16>
    %cst_18 = arith.constant dense<0.000000e+00> : vector<64x8xf32>
    %46 = tpu.matmul %5, %45, %cst_18 {dimension_numbers = #tpu.dot_dimension_numbers<[1], [0], [0], [1], [0, 0, 1, 1], [], []>} : vector<64x8xbf16>, vector<8x8xbf16>, vector<64x8xf32> -> vector<64x8xf32>
    %47 = arith.addf %44, %46 : vector<64x8xf32>
    %48 = vector.extract_strided_slice %43 {offsets = [8, 0], sizes = [8, 8], strides = [1, 1]} : vector<32x8xbf16> to vector<8x8xbf16>
    %cst_19 = arith.constant dense<0.000000e+00> : vector<64x8xf32>
    %49 = tpu.matmul %7, %48, %cst_19 {dimension_numbers = #tpu.dot_dimension_numbers<[1], [0], [0], [1], [0, 0, 1, 1], [], []>} : vector<64x8xbf16>, vector<8x8xbf16>, vector<64x8xf32> -> vector<64x8xf32>
    %50 = arith.addf %47, %49 : vector<64x8xf32>
    %51 = vector.extract_strided_slice %43 {offsets = [16, 0], sizes = [8, 8], strides = [1, 1]} : vector<32x8xbf16> to vector<8x8xbf16>
    %cst_20 = arith.constant dense<0.000000e+00> : vector<64x8xf32>
    %52 = tpu.matmul %11, %51, %cst_20 {dimension_numbers = #tpu.dot_dimension_numbers<[1], [0], [0], [1], [0, 0, 1, 1], [], []>} : vector<64x8xbf16>, vector<8x8xbf16>, vector<64x8xf32> -> vector<64x8xf32>
    %53 = arith.addf %50, %52 : vector<64x8xf32>
    %54 = vector.extract_strided_slice %43 {offsets = [24, 0], sizes = [8, 8], strides = [1, 1]} : vector<32x8xbf16> to vector<8x8xbf16>
    %cst_21 = arith.constant dense<0.000000e+00> : vector<64x8xf32>
    %55 = tpu.matmul %13, %54, %cst_21 {dimension_numbers = #tpu.dot_dimension_numbers<[1], [0], [0], [1], [0, 0, 1, 1], [], []>} : vector<64x8xbf16>, vector<8x8xbf16>, vector<64x8xf32> -> vector<64x8xf32>
    %56 = arith.addf %53, %55 : vector<64x8xf32>
    %cst_22 = arith.constant dense<0.000000e+00> : vector<8xf32>
    %57 = vector.multi_reduction <add>, %56, %cst_22 [0] : vector<64x8xf32> to vector<8xf32>
    %58 = vector.shape_cast %57 : vector<8xf32> to vector<1x8xf32>
    %59 = arith.addf %38, %58 : vector<1x8xf32>
    %c1_23 = arith.constant 1 : index
    %c0_24 = arith.constant 0 : index
    %c0_25 = arith.constant 0 : index
    %60 = vector.load %arg5[%c1_23, %c0_24, %c0_25] : memref<4x64x8xf32, #tpu.memory_space<vmem>>, vector<1x64x8xf32>
    %61 = vector.shape_cast %60 : vector<1x64x8xf32> to vector<64x8xf32>
    %62 = vector.shape_cast %56 : vector<64x8xf32> to vector<1x64x8xf32>
    tpu.vector_store %arg5[%c1_23, %c0_24, %c0_25], %62 {strides = array<i32>} : memref<4x64x8xf32, #tpu.memory_space<vmem>>, vector<1x64x8xf32>,
    %c2 = arith.constant 2 : index
    %c0_26 = arith.constant 0 : index
    %c0_27 = arith.constant 0 : index
    %63 = vector.load %arg2[%c2, %c0_26, %c0_27] : memref<4x32x8xbf16, #tpu.memory_space<vmem>>, vector<1x32x8xbf16>
    %64 = vector.shape_cast %63 : vector<1x32x8xbf16> to vector<32x8xbf16>
    %cst_28 = arith.constant 0.000000e+00 : f32
    %65 = vector.broadcast %cst_28 : f32 to vector<64x8xf32>
    %66 = vector.extract_strided_slice %64 {offsets = [0, 0], sizes = [8, 8], strides = [1, 1]} : vector<32x8xbf16> to vector<8x8xbf16>
    %cst_29 = arith.constant dense<0.000000e+00> : vector<64x8xf32>
    %67 = tpu.matmul %9, %66, %cst_29 {dimension_numbers = #tpu.dot_dimension_numbers<[1], [0], [0], [1], [0, 0, 1, 1], [], []>} : vector<64x8xbf16>, vector<8x8xbf16>, vector<64x8xf32> -> vector<64x8xf32>
    %68 = arith.addf %65, %67 : vector<64x8xf32>
    %69 = vector.extract_strided_slice %64 {offsets = [8, 0], sizes = [8, 8], strides = [1, 1]} : vector<32x8xbf16> to vector<8x8xbf16>
    %cst_30 = arith.constant dense<0.000000e+00> : vector<64x8xf32>
    %70 = tpu.matmul %11, %69, %cst_30 {dimension_numbers = #tpu.dot_dimension_numbers<[1], [0], [0], [1], [0, 0, 1, 1], [], []>} : vector<64x8xbf16>, vector<8x8xbf16>, vector<64x8xf32> -> vector<64x8xf32>
    %71 = arith.addf %68, %70 : vector<64x8xf32>
    %72 = vector.extract_strided_slice %64 {offsets = [16, 0], sizes = [8, 8], strides = [1, 1]} : vector<32x8xbf16> to vector<8x8xbf16>
    %cst_31 = arith.constant dense<0.000000e+00> : vector<64x8xf32>
    %73 = tpu.matmul %15, %72, %cst_31 {dimension_numbers = #tpu.dot_dimension_numbers<[1], [0], [0], [1], [0, 0, 1, 1], [], []>} : vector<64x8xbf16>, vector<8x8xbf16>, vector<64x8xf32> -> vector<64x8xf32>
    %74 = arith.addf %71, %73 : vector<64x8xf32>
    %75 = vector.extract_strided_slice %64 {offsets = [24, 0], sizes = [8, 8], strides = [1, 1]} : vector<32x8xbf16> to vector<8x8xbf16>
    %cst_32 = arith.constant dense<0.000000e+00> : vector<64x8xf32>
    %76 = tpu.matmul %17, %75, %cst_32 {dimension_numbers = #tpu.dot_dimension_numbers<[1], [0], [0], [1], [0, 0, 1, 1], [], []>} : vector<64x8xbf16>, vector<8x8xbf16>, vector<64x8xf32> -> vector<64x8xf32>
    %77 = arith.addf %74, %76 : vector<64x8xf32>
    %cst_33 = arith.constant dense<0.000000e+00> : vector<8xf32>
    %78 = vector.multi_reduction <add>, %77, %cst_33 [0] : vector<64x8xf32> to vector<8xf32>
    %79 = vector.shape_cast %78 : vector<8xf32> to vector<1x8xf32>
    %80 = arith.addf %59, %79 : vector<1x8xf32>
    %c2_34 = arith.constant 2 : index
    %c0_35 = arith.constant 0 : index
    %c0_36 = arith.constant 0 : index
    %81 = vector.load %arg5[%c2_34, %c0_35, %c0_36] : memref<4x64x8xf32, #tpu.memory_space<vmem>>, vector<1x64x8xf32>
    %82 = vector.shape_cast %81 : vector<1x64x8xf32> to vector<64x8xf32>
    %83 = vector.shape_cast %77 : vector<64x8xf32> to vector<1x64x8xf32>
    tpu.vector_store %arg5[%c2_34, %c0_35, %c0_36], %83 {strides = array<i32>} : memref<4x64x8xf32, #tpu.memory_space<vmem>>, vector<1x64x8xf32>,
    %c3 = arith.constant 3 : index
    %c0_37 = arith.constant 0 : index
    %c0_38 = arith.constant 0 : index
    %84 = vector.load %arg2[%c3, %c0_37, %c0_38] : memref<4x32x8xbf16, #tpu.memory_space<vmem>>, vector<1x32x8xbf16>
    %85 = vector.shape_cast %84 : vector<1x32x8xbf16> to vector<32x8xbf16>
    %cst_39 = arith.constant 0.000000e+00 : f32
    %86 = vector.broadcast %cst_39 : f32 to vector<64x8xf32>
    %87 = vector.extract_strided_slice %85 {offsets = [0, 0], sizes = [8, 8], strides = [1, 1]} : vector<32x8xbf16> to vector<8x8xbf16>
    %cst_40 = arith.constant dense<0.000000e+00> : vector<64x8xf32>
    %88 = tpu.matmul %11, %87, %cst_40 {dimension_numbers = #tpu.dot_dimension_numbers<[1], [0], [0], [1], [0, 0, 1, 1], [], []>} : vector<64x8xbf16>, vector<8x8xbf16>, vector<64x8xf32> -> vector<64x8xf32>
    %89 = arith.addf %86, %88 : vector<64x8xf32>
    %90 = vector.extract_strided_slice %85 {offsets = [8, 0], sizes = [8, 8], strides = [1, 1]} : vector<32x8xbf16> to vector<8x8xbf16>
    %cst_41 = arith.constant dense<0.000000e+00> : vector<64x8xf32>
    %91 = tpu.matmul %13, %90, %cst_41 {dimension_numbers = #tpu.dot_dimension_numbers<[1], [0], [0], [1], [0, 0, 1, 1], [], []>} : vector<64x8xbf16>, vector<8x8xbf16>, vector<64x8xf32> -> vector<64x8xf32>
    %92 = arith.addf %89, %91 : vector<64x8xf32>
    %93 = vector.extract_strided_slice %85 {offsets = [16, 0], sizes = [8, 8], strides = [1, 1]} : vector<32x8xbf16> to vector<8x8xbf16>
    %cst_42 = arith.constant dense<0.000000e+00> : vector<64x8xf32>
    %94 = tpu.matmul %17, %93, %cst_42 {dimension_numbers = #tpu.dot_dimension_numbers<[1], [0], [0], [1], [0, 0, 1, 1], [], []>} : vector<64x8xbf16>, vector<8x8xbf16>, vector<64x8xf32> -> vector<64x8xf32>
    %95 = arith.addf %92, %94 : vector<64x8xf32>
    %96 = vector.extract_strided_slice %85 {offsets = [24, 0], sizes = [8, 8], strides = [1, 1]} : vector<32x8xbf16> to vector<8x8xbf16>
    %cst_43 = arith.constant dense<0.000000e+00> : vector<64x8xf32>
    %97 = tpu.matmul %19, %96, %cst_43 {dimension_numbers = #tpu.dot_dimension_numbers<[1], [0], [0], [1], [0, 0, 1, 1], [], []>} : vector<64x8xbf16>, vector<8x8xbf16>, vector<64x8xf32> -> vector<64x8xf32>
    %98 = arith.addf %95, %97 : vector<64x8xf32>
    %cst_44 = arith.constant dense<0.000000e+00> : vector<8xf32>
    %99 = vector.multi_reduction <add>, %98, %cst_44 [0] : vector<64x8xf32> to vector<8xf32>
    %100 = vector.shape_cast %99 : vector<8xf32> to vector<1x8xf32>
    %101 = arith.addf %80, %100 : vector<1x8xf32>
    %c3_45 = arith.constant 3 : index
    %c0_46 = arith.constant 0 : index
    %c0_47 = arith.constant 0 : index
    %102 = vector.load %arg5[%c3_45, %c0_46, %c0_47] : memref<4x64x8xf32, #tpu.memory_space<vmem>>, vector<1x64x8xf32>
    %103 = vector.shape_cast %102 : vector<1x64x8xf32> to vector<64x8xf32>
    %104 = vector.shape_cast %98 : vector<64x8xf32> to vector<1x64x8xf32>
    tpu.vector_store %arg5[%c3_45, %c0_46, %c0_47], %104 {strides = array<i32>} : memref<4x64x8xf32, #tpu.memory_space<vmem>>, vector<1x64x8xf32>,
    %cst_48 = arith.constant 2.560000e+02 : f32
    %105 = vector.broadcast %cst_48 : f32 to vector<1x8xf32>
    %106 = arith.divf %101, %105 : vector<1x8xf32>
    %cst_49 = arith.constant 0.000000e+00 : f32
    %107 = vector.broadcast %cst_49 : f32 to vector<1x8xf32>
    %c0_50 = arith.constant 0 : index
    %c0_51 = arith.constant 0 : index
    %c0_52 = arith.constant 0 : index
    %108 = vector.load %arg5[%c0_50, %c0_51, %c0_52] : memref<4x64x8xf32, #tpu.memory_space<vmem>>, vector<1x64x8xf32>
    %109 = vector.shape_cast %108 : vector<1x64x8xf32> to vector<64x8xf32>
    %110 = vector.broadcast %106 : vector<1x8xf32> to vector<64x8xf32>
    %111 = arith.subf %109, %110 : vector<64x8xf32>
    %112 = arith.mulf %111, %111 : vector<64x8xf32>
    %cst_53 = arith.constant dense<0.000000e+00> : vector<8xf32>
    %113 = vector.multi_reduction <add>, %112, %cst_53 [0] : vector<64x8xf32> to vector<8xf32>
    %114 = vector.shape_cast %113 : vector<8xf32> to vector<1x8xf32>
    %115 = arith.addf %107, %114 : vector<1x8xf32>
    %c1_54 = arith.constant 1 : index
    %c0_55 = arith.constant 0 : index
    %c0_56 = arith.constant 0 : index
    %116 = vector.load %arg5[%c1_54, %c0_55, %c0_56] : memref<4x64x8xf32, #tpu.memory_space<vmem>>, vector<1x64x8xf32>
    %117 = vector.shape_cast %116 : vector<1x64x8xf32> to vector<64x8xf32>
    %118 = vector.broadcast %106 : vector<1x8xf32> to vector<64x8xf32>
    %119 = arith.subf %117, %118 : vector<64x8xf32>
    %120 = arith.mulf %119, %119 : vector<64x8xf32>
    %cst_57 = arith.constant dense<0.000000e+00> : vector<8xf32>
    %121 = vector.multi_reduction <add>, %120, %cst_57 [0] : vector<64x8xf32> to vector<8xf32>
    %122 = vector.shape_cast %121 : vector<8xf32> to vector<1x8xf32>
    %123 = arith.addf %115, %122 : vector<1x8xf32>
    %c2_58 = arith.constant 2 : index
    %c0_59 = arith.constant 0 : index
    %c0_60 = arith.constant 0 : index
    %124 = vector.load %arg5[%c2_58, %c0_59, %c0_60] : memref<4x64x8xf32, #tpu.memory_space<vmem>>, vector<1x64x8xf32>
    %125 = vector.shape_cast %124 : vector<1x64x8xf32> to vector<64x8xf32>
    %126 = vector.broadcast %106 : vector<1x8xf32> to vector<64x8xf32>
    %127 = arith.subf %125, %126 : vector<64x8xf32>
    %128 = arith.mulf %127, %127 : vector<64x8xf32>
    %cst_61 = arith.constant dense<0.000000e+00> : vector<8xf32>
    %129 = vector.multi_reduction <add>, %128, %cst_61 [0] : vector<64x8xf32> to vector<8xf32>
    %130 = vector.shape_cast %129 : vector<8xf32> to vector<1x8xf32>
    %131 = arith.addf %123, %130 : vector<1x8xf32>
    %c3_62 = arith.constant 3 : index
    %c0_63 = arith.constant 0 : index
    %c0_64 = arith.constant 0 : index
    %132 = vector.load %arg5[%c3_62, %c0_63, %c0_64] : memref<4x64x8xf32, #tpu.memory_space<vmem>>, vector<1x64x8xf32>
    %133 = vector.shape_cast %132 : vector<1x64x8xf32> to vector<64x8xf32>
    %134 = vector.broadcast %106 : vector<1x8xf32> to vector<64x8xf32>
    %135 = arith.subf %133, %134 : vector<64x8xf32>
    %136 = arith.mulf %135, %135 : vector<64x8xf32>
    %cst_65 = arith.constant dense<0.000000e+00> : vector<8xf32>
    %137 = vector.multi_reduction <add>, %136, %cst_65 [0] : vector<64x8xf32> to vector<8xf32>
    %138 = vector.shape_cast %137 : vector<8xf32> to vector<1x8xf32>
    %139 = arith.addf %131, %138 : vector<1x8xf32>
    %cst_66 = arith.constant 2.560000e+02 : f32
    %140 = vector.broadcast %cst_66 : f32 to vector<1x8xf32>
    %141 = arith.divf %139, %140 : vector<1x8xf32>
    %cst_67 = arith.constant 9.99999974E-6 : f32
    %142 = vector.broadcast %cst_67 : f32 to vector<1x8xf32>
    %143 = arith.addf %141, %142 : vector<1x8xf32>
    %144 = math.rsqrt %143 : vector<1x8xf32>
    %c0_68 = arith.constant 0 : index
    %c0_69 = arith.constant 0 : index
    %c0_70 = arith.constant 0 : index
    %c0_71 = arith.constant 0 : index
    %c0_72 = arith.constant 0 : index
    %145 = vector.load %arg3[%c0_68, %c0_69, %c0_70, %c0_71, %c0_72] : memref<1x8x2x8x16xbf16, #tpu.memory_space<vmem>>, vector<1x8x1x8x16xbf16>
    %146 = vector.shape_cast %145 : vector<1x8x1x8x16xbf16> to vector<8x8x16xbf16>
    %c0_73 = arith.constant 0 : index
    %c0_74 = arith.constant 0 : index
    %c0_75 = arith.constant 0 : index
    %147 = vector.load %arg5[%c0_73, %c0_74, %c0_75] : memref<4x64x8xf32, #tpu.memory_space<vmem>>, vector<1x64x8xf32>
    %148 = vector.shape_cast %147 : vector<1x64x8xf32> to vector<64x8xf32>
    %149 = vector.broadcast %106 : vector<1x8xf32> to vector<64x8xf32>
    %150 = arith.subf %148, %149 : vector<64x8xf32>
    %151 = vector.broadcast %144 : vector<1x8xf32> to vector<64x8xf32>
    %152 = arith.mulf %150, %151 : vector<64x8xf32>
    %cst_76 = arith.constant 0.000000e+00 : f32
    %153 = vector.broadcast %cst_76 : f32 to vector<64x8xf32>
    %154 = arith.cmpf oge, %152, %153 : vector<64x8xf32>
    %cst_77 = arith.constant 0.00999999977 : f32
    %155 = vector.broadcast %cst_77 : f32 to vector<64x8xf32>
    %156 = arith.mulf %155, %152 : vector<64x8xf32>
    %157 = arith.select %154, %152, %156 : vector<64x8xi1>, vector<64x8xf32>
    %158 = vector.shape_cast %157 : vector<64x8xf32> to vector<8x8x8xf32>
    %159 = arith.truncf %158 : vector<8x8x8xf32> to vector<8x8x8xbf16>
    %160 = vector.extract_strided_slice %146 {offsets = [0, 0, 0], sizes = [8, 8, 8], strides = [1, 1, 1]} : vector<8x8x16xbf16> to vector<8x8x8xbf16>
    %c1_78 = arith.constant 1 : index
    %c0_79 = arith.constant 0 : index
    %c0_80 = arith.constant 0 : index
    %161 = vector.load %arg5[%c1_78, %c0_79, %c0_80] : memref<4x64x8xf32, #tpu.memory_space<vmem>>, vector<1x64x8xf32>
    %162 = vector.shape_cast %161 : vector<1x64x8xf32> to vector<64x8xf32>
    %163 = vector.broadcast %106 : vector<1x8xf32> to vector<64x8xf32>
    %164 = arith.subf %162, %163 : vector<64x8xf32>
    %165 = vector.broadcast %144 : vector<1x8xf32> to vector<64x8xf32>
    %166 = arith.mulf %164, %165 : vector<64x8xf32>
    %cst_81 = arith.constant 0.000000e+00 : f32
    %167 = vector.broadcast %cst_81 : f32 to vector<64x8xf32>
    %168 = arith.cmpf oge, %166, %167 : vector<64x8xf32>
    %cst_82 = arith.constant 0.00999999977 : f32
    %169 = vector.broadcast %cst_82 : f32 to vector<64x8xf32>
    %170 = arith.mulf %169, %166 : vector<64x8xf32>
    %171 = arith.select %168, %166, %170 : vector<64x8xi1>, vector<64x8xf32>
    %172 = vector.shape_cast %171 : vector<64x8xf32> to vector<8x8x8xf32>
    %173 = arith.truncf %172 : vector<8x8x8xf32> to vector<8x8x8xbf16>
    %174 = vector.extract_strided_slice %146 {offsets = [0, 0, 8], sizes = [8, 8, 8], strides = [1, 1, 1]} : vector<8x8x16xbf16> to vector<8x8x8xbf16>
    %175 = tpu.concatenate %159, %160, %173, %174 in 2 : vector<8x8x8xbf16>, vector<8x8x8xbf16>, vector<8x8x8xbf16>, vector<8x8x8xbf16> -> vector<8x8x32xbf16>
    %c0_83 = arith.constant 0 : index
    %c0_84 = arith.constant 0 : index
    %c0_85 = arith.constant 0 : index
    %c0_86 = arith.constant 0 : index
    %c0_87 = arith.constant 0 : index
    %176 = vector.load %arg4[%c0_83, %c0_84, %c0_85, %c0_86, %c0_87] : memref<1x8x2x8x32xbf16, #tpu.memory_space<vmem>>, vector<1x8x1x8x32xbf16>
    %177 = vector.shape_cast %176 : vector<1x8x1x8x32xbf16> to vector<8x8x32xbf16>
    %178 = vector.shape_cast %175 : vector<8x8x32xbf16> to vector<1x8x1x8x32xbf16>
    tpu.vector_store %arg4[%c0_83, %c0_84, %c0_85, %c0_86, %c0_87], %178 {strides = array<i32>} : memref<1x8x2x8x32xbf16, #tpu.memory_space<vmem>>, vector<1x8x1x8x32xbf16>,
    %c0_88 = arith.constant 0 : index
    %c0_89 = arith.constant 0 : index
    %c1_90 = arith.constant 1 : index
    %c0_91 = arith.constant 0 : index
    %c0_92 = arith.constant 0 : index
    %179 = vector.load %arg3[%c0_88, %c0_89, %c1_90, %c0_91, %c0_92] : memref<1x8x2x8x16xbf16, #tpu.memory_space<vmem>>, vector<1x8x1x8x16xbf16>
    %180 = vector.shape_cast %179 : vector<1x8x1x8x16xbf16> to vector<8x8x16xbf16>
    %c2_93 = arith.constant 2 : index
    %c0_94 = arith.constant 0 : index
    %c0_95 = arith.constant 0 : index
    %181 = vector.load %arg5[%c2_93, %c0_94, %c0_95] : memref<4x64x8xf32, #tpu.memory_space<vmem>>, vector<1x64x8xf32>
    %182 = vector.shape_cast %181 : vector<1x64x8xf32> to vector<64x8xf32>
    %183 = vector.broadcast %106 : vector<1x8xf32> to vector<64x8xf32>
    %184 = arith.subf %182, %183 : vector<64x8xf32>
    %185 = vector.broadcast %144 : vector<1x8xf32> to vector<64x8xf32>
    %186 = arith.mulf %184, %185 : vector<64x8xf32>
    %cst_96 = arith.constant 0.000000e+00 : f32
    %187 = vector.broadcast %cst_96 : f32 to vector<64x8xf32>
    %188 = arith.cmpf oge, %186, %187 : vector<64x8xf32>
    %cst_97 = arith.constant 0.00999999977 : f32
    %189 = vector.broadcast %cst_97 : f32 to vector<64x8xf32>
    %190 = arith.mulf %189, %186 : vector<64x8xf32>
    %191 = arith.select %188, %186, %190 : vector<64x8xi1>, vector<64x8xf32>
    %192 = vector.shape_cast %191 : vector<64x8xf32> to vector<8x8x8xf32>
    %193 = arith.truncf %192 : vector<8x8x8xf32> to vector<8x8x8xbf16>
    %194 = vector.extract_strided_slice %180 {offsets = [0, 0, 0], sizes = [8, 8, 8], strides = [1, 1, 1]} : vector<8x8x16xbf16> to vector<8x8x8xbf16>
    %c3_98 = arith.constant 3 : index
    %c0_99 = arith.constant 0 : index
    %c0_100 = arith.constant 0 : index
    %195 = vector.load %arg5[%c3_98, %c0_99, %c0_100] : memref<4x64x8xf32, #tpu.memory_space<vmem>>, vector<1x64x8xf32>
    %196 = vector.shape_cast %195 : vector<1x64x8xf32> to vector<64x8xf32>
    %197 = vector.broadcast %106 : vector<1x8xf32> to vector<64x8xf32>
    %198 = arith.subf %196, %197 : vector<64x8xf32>
    %199 = vector.broadcast %144 : vector<1x8xf32> to vector<64x8xf32>
    %200 = arith.mulf %198, %199 : vector<64x8xf32>
    %cst_101 = arith.constant 0.000000e+00 : f32
    %201 = vector.broadcast %cst_101 : f32 to vector<64x8xf32>
    %202 = arith.cmpf oge, %200, %201 : vector<64x8xf32>
    %cst_102 = arith.constant 0.00999999977 : f32
    %203 = vector.broadcast %cst_102 : f32 to vector<64x8xf32>
    %204 = arith.mulf %203, %200 : vector<64x8xf32>
    %205 = arith.select %202, %200, %204 : vector<64x8xi1>, vector<64x8xf32>
    %206 = vector.shape_cast %205 : vector<64x8xf32> to vector<8x8x8xf32>
    %207 = arith.truncf %206 : vector<8x8x8xf32> to vector<8x8x8xbf16>
    %208 = vector.extract_strided_slice %180 {offsets = [0, 0, 8], sizes = [8, 8, 8], strides = [1, 1, 1]} : vector<8x8x16xbf16> to vector<8x8x8xbf16>
    %209 = tpu.concatenate %193, %194, %207, %208 in 2 : vector<8x8x8xbf16>, vector<8x8x8xbf16>, vector<8x8x8xbf16>, vector<8x8x8xbf16> -> vector<8x8x32xbf16>
    %c0_103 = arith.constant 0 : index
    %c0_104 = arith.constant 0 : index
    %c1_105 = arith.constant 1 : index
    %c0_106 = arith.constant 0 : index
    %c0_107 = arith.constant 0 : index
    %210 = vector.load %arg4[%c0_103, %c0_104, %c1_105, %c0_106, %c0_107] : memref<1x8x2x8x32xbf16, #tpu.memory_space<vmem>>, vector<1x8x1x8x32xbf16>
    %211 = vector.shape_cast %210 : vector<1x8x1x8x32xbf16> to vector<8x8x32xbf16>
    %212 = vector.shape_cast %209 : vector<8x8x32xbf16> to vector<1x8x1x8x32xbf16>
    tpu.vector_store %arg4[%c0_103, %c0_104, %c1_105, %c0_106, %c0_107], %212 {strides = array<i32>} : memref<1x8x2x8x32xbf16, #tpu.memory_space<vmem>>, vector<1x8x1x8x32xbf16>,
    return
  }
  func.func @transform_0(%arg0: i32) -> (i32, i32, i32, i32) {
    %c0_i32 = arith.constant 0 : i32
    %c0_i32_0 = arith.constant 0 : i32
    %c0_i32_1 = arith.constant 0 : i32
    %c0_i32_2 = arith.constant 0 : i32
    return %arg0, %c0_i32, %c0_i32_0, %c0_i32_1 : i32, i32, i32, i32
  }
  func.func @transform_1(%arg0: i32) -> (i32, i32, i32) {
    %c0_i32 = arith.constant 0 : i32
    %c0_i32_0 = arith.constant 0 : i32
    %c0_i32_1 = arith.constant 0 : i32
    %c0_i32_2 = arith.constant 0 : i32
    return %c0_i32, %c0_i32_0, %c0_i32_1 : i32, i32, i32
  }
  func.func @transform_2(%arg0: i32) -> (i32, i32, i32, i32, i32) {
    %c0_i32 = arith.constant 0 : i32
    %c0_i32_0 = arith.constant 0 : i32
    %c0_i32_1 = arith.constant 0 : i32
    %c0_i32_2 = arith.constant 0 : i32
    %c0_i32_3 = arith.constant 0 : i32
    return %arg0, %c0_i32, %c0_i32_0, %c0_i32_1, %c0_i32_2 : i32, i32, i32, i32, i32
  }
  func.func @transform_3(%arg0: i32) -> (i32, i32, i32, i32, i32) {
    %c0_i32 = arith.constant 0 : i32
    %c0_i32_0 = arith.constant 0 : i32
    %c0_i32_1 = arith.constant 0 : i32
    %c0_i32_2 = arith.constant 0 : i32
    %c0_i32_3 = arith.constant 0 : i32
    return %arg0, %c0_i32, %c0_i32_0, %c0_i32_1, %c0_i32_2 : i32, i32, i32, i32, i32
  }
}

</mosaic_0001>

<bundles_post_ra>
// kernel: unet_up.1
= control target key start
LH: loop header
LB: loop body
LE: loop exit
PB: predicated region body
PF: predicated region fallthrough
CT: control target
= control target key end

     0   :  { %s3110_s12 = smov 0   ;;  %s4258_s0 = inlined_call_operand.vmem [shape: bf16[2,10,10,8], index: 0, kind: input, shape index: {}]   ;;  %s4259_s1 = inlined_call_operand.vmem [shape: bf16[4,32,8], index: 1, kind: input, shape index: {}]   ;;  %s4260_s2 = inlined_call_operand.vmem [shape: bf16[2,8,2,8,16], index: 2, kind: input, shape index: {}]   ;;  %s4261_s3 = inlined_call_operand.vmem [shape: bf16[2,8,2,8,32], index: 3, kind: output, shape index: {}]  }
   0x1 LB: > { %s2625_s13 = sadd.s32 4294967295, %s3086_s12   ;;  %p2629_p0 = scmp.ge.s32.totalorder %s3086_s12, 1  ;;  %s3086_s12 = sphi %s3110_s12, %s13_s12  }
   0x2   : > { %p147_p1 = scmp.lt.s32.totalorder %s3086_s12, 3 }
   0x4   : > { %p148_p2 = pnand %p2629_p0, %p147_p1 }
   0x5   : > { %p176_p3 = scmp.lt.s32.totalorder (!%p148_p2), %s2625_s13, 1  ;;  %s3088_s29 = smov (!%p148_p2), 8  }
   0x6   : > { %151 = sbr.rel (%p148_p2) target bundleno = 612 (0x264), region = 32  ;;  %s3089_s30 = smov (!%p148_p2), 16  }
   0xb   : > { %v418_v0 = vld [vmem:[%s4259_s1] sm:$0xf]  ;;  %vm447_vm0 = vcmask 1043456   ;;  %v419_v1 = vld [vmem:[%s4259_s1 + $0x4] sm:$0xf]  ;;  %s4267_s13 = smov (!%p176_p3, %s2625_s13), 1 }
   0xc   : > { %3025 = vmatprep.subr.msk.bf16.mxu1 %vm447_vm0, %v418_v0  ;;  %v541_v2 = vsel %vm447_vm0, %v418_v0, 0  ;;  %3024 = vmatprep.subr.msk.bf16.mxu0 %vm447_vm0, %v419_v1  ;;  %v449_v3 = vsel %vm447_vm0, %v419_v1, 0  ;;  %v3133_v4 = vld [vmem:[%s4259_s1 + $0x8] sm:$0xf]  ;;  %v421_v5 = vld [vmem:[%s4259_s1 + $0xc] sm:$0xf] }
   0xd   : > { %2875 = vmatpush3.bf16.msra.mxu1 %v541_v2  ;;  %2865 = vmatpush3.bf16.msra.mxu0 %v449_v3  ;;  %s3040_s22 = smul.u32 80, %s4267_s13  ;;  %vm434_vm1 = vcmask 64512   ;;  %vm212_vm2 = vsmask.f32 3328  ;;  %v719_v16 = vsel %vm447_vm0, %v421_v5, 0  ;;  %vm343_vm5 = vcmask 1042432  }
   0xe   : > { %3026 = vmatprep.subr.msk.bf16.mxu0 %vm447_vm0, %v3133_v4  ;;  %3027 = vmatprep.subr.msk.bf16.mxu1 %vm447_vm0, %v421_v5  ;;  %vm213_vm3 = vsmask.f32 7440  ;;  %v3181_v18 = vld [vmem:[%s4259_s1 + $0x10] sm:$0xf]  ;;  %vm344_vm6 = vcmask 1046532  }
   0xf   : > { %s3145_s25 = scalar_lea.vmem %s4258_s0, %s3040_s22  ;;  %vm3202_vm4 = vmor %vm212_vm2, %vm213_vm3 }
  0x10   : > { %v3148_v6 = vld [vmem:[%s3145_s25] sm:$0xf]  ;;  %v3151_v7 = vld [vmem:[%s3145_s25 + $0x8] sm:$0xf]  ;;  %v3158_v11 = vld [vmem:[%s3145_s25 + $0x10] sm:$0xf] }
  0x11   : > { %v216_v8 = vshrl.u32 %v3148_v6, 16  ;;  %v219_v9 = vshll.u32 %v3148_v6, 16  ;;  %v2653_v10 = vcombine.low %v3148_v6, %v3151_v7  ;;  %v3161_v12 = vld [vmem:[%s3145_s25 + $0x18] sm:$0xf]  ;;  %v3168_v14 = vld [vmem:[%s3145_s25 + $0x4] sm:$0x1]  ;;  %vm3363_vm7 = vmor %vm343_vm5, %vm344_vm6 }
  0x12   : > { %v3165_v13 = vcombine.low %v3158_v11, %v3161_v12  ;;  %v3171_v15 = vld [vmem:[%s3145_s25 + $0xc] sm:$0x1]  ;;  %v3176_v17 = vld [vmem:[%s3145_s25 + $0x14] sm:$0x1]  ;;  %v225_v21 = vshll.u32 %v3168_v14, 16  ;;  %v230_v22 = vshrl.u32 %v3151_v7, 16 }
  0x13   : > { %2876 = vmatprep.mubr.msk.bf16.mxu1 %vm434_vm1, %v2653_v10  ;;  %v218_v19 = vrot.slane %v216_v8, 4  ;;  %v221_v20 = vrot.slane %v219_v9, 5  ;;  %v233_v23 = vshll.u32 %v3151_v7, 16  ;;  %v239_v24 = vshll.u32 %v3171_v15, 16  ;;  %v3192_v27 = vld [vmem:[%s3145_s25 + $0x1c] sm:$0x1] }
  0x14   : > { %2877 = vmatmul.mubr.msk.bf16.vlgmr.msra.gmra.mxu1 %vm434_vm1, %v3165_v13  ;;  %v244_v25 = vshrl.u32 %v3158_v11, 16  ;;  %v247_v26 = vshll.u32 %v3158_v11, 16  ;;  %v3195_v28 = vld [vmem:[%s3145_s25 + $0x20] sm:$0xf]  ;;  %v232_v30 = vrot.slane %v230_v22, 4  ;;  %v253_v31 = vshll.u32 %v3176_v17, 16 }
  0x15   : > { %2895 = vmatpush3.bf16.msra.mxu1 %v719_v16  ;;  %v222_v29 = vor.u32 %v221_v20, %v218_v19  ;;  %v227_v32 = vrot.slane %v225_v21, 5  ;;  %v235_v33 = vrot.slane %v233_v23, 5  ;;  %v241_v38 = vrot.slane %v239_v24, 5  ;;  %v3209_v41 = vld [vmem:[%s3145_s25 + $0x24] sm:$0x1] }
  0x16   : > { %3029 = vmatprep.subr.msk.bf16.mxu1 %vm447_vm0, %v3181_v18  ;;  %v246_v34 = vrot.slane %v244_v25, 4  ;;  %v249_v35 = vrot.slane %v247_v26, 5  ;;  %v258_v39 = vshrl.u32 %v3161_v12, 16  ;;  %v261_v40 = vshll.u32 %v3161_v12, 16  ;;  %v3222_v62 = vld [vmem:[%s3145_s25 + $0x28] sm:$0xf] }
  0x17   : > { %v223_v37 = vrot.slane %v222_v29, 4  ;;  %v236_v42 = vor.u32 %v235_v33, %v232_v30  ;;  %v267_v44 = vshll.u32 %v3192_v27, 16  ;;  %v272_v45 = vshrl.u32 %v3195_v28, 16  ;;  %v3225_v63 = vld [vmem:[%s3145_s25 + $0x30] sm:$0xf] }
  0x18   : > { %v250_v43 = vor.u32 %v249_v35, %v246_v34  ;;  %v255_v46 = vrot.slane %v253_v31, 5  ;;  %v260_v47 = vrot.slane %v258_v39, 4  ;;  %v263_v48 = vrot.slane %v261_v40, 5  ;;  %v3236_v5 = vld [vmem:[%s3145_s25 + $0x38] sm:$0xf] }
  0x19   : > { %v275_v49 = vshll.u32 %v3195_v28, 16  ;;  %v228_v50 = vsel %vm3202_vm4, %v223_v37, %v227_v32  ;;  %v237_v51 = vrot.slane %v236_v42, 4  ;;  %v274_v53 = vrot.slane %v272_v45, 4  ;;  %v3239_v8 = vld [vmem:[%s3145_s25 + $0x2c] sm:$0x1] }
  0x1a   : > { %v251_v52 = vrot.slane %v250_v43, 4  ;;  %v264_v54 = vor.u32 %v263_v48, %v260_v47  ;;  %v269_v55 = vrot.slane %v267_v44, 5  ;;  %v281_v57 = vshll.u32 %v3209_v41, 16  ;;  %v3248_v19 = vld [vmem:[%s3145_s25 + $0x34] sm:$0x1] }
  0x1b   : > { %v277_v56 = vrot.slane %v275_v49, 5  ;;  %v242_v58 = vsel %vm3202_vm4, %v237_v51, %v241_v38  ;;  %v3233_v3 = vcombine.low %v3195_v28, %v3222_v62  ;;  %v3245_v16 = vcombine.low %v3225_v63, %v3236_v5  ;;  %v3263_v24 = vld [vmem:[%s4259_s1 + $0x14] sm:$0xf]  ;;  %v3269_v26 = vld [vmem:[%s3145_s25 + $0x3c] sm:$0x1] }
  0x1c   : > { %v256_v59 = vsel %vm3202_vm4, %v251_v52, %v255_v46  ;;  %v265_v60 = vrot.slane %v264_v54, 4  ;;  %v283_v0 = vrot.slane %v281_v57, 5  ;;  %v3227_v1 = vcombine.low %v228_v50, %v242_v58  ;;  %v3281_v34 = vld [vmem:[%s3145_s25 + $0x40] sm:$0xf]  ;;  %v3291_v45 = vld [vmem:[%s3145_s25 + $0x44] sm:$0x1] }
  0x1d   : > { %v278_v61 = vor.u32 %v277_v56, %v274_v53  ;;  %v3229_v2 = vcombine.low %v242_v58, %v256_v59  ;;  %v626_v21 = vsel %vm447_vm0, %v3133_v4, 0  ;;  %2880 = vmatprep.mubr.msk.bf16.mxu1 %vm434_vm1, %v3233_v3  ;;  %v286_v22 = vshrl.u32 %v3222_v62, 16 }
  0x1e   : > { %v270_v9 = vsel %vm3202_vm4, %v265_v60, %v269_v55  ;;  %2866 = vmatprep.mubr.msk.bf16.mxu0 %vm434_vm1, %v3227_v1  ;;  %v289_v23 = vshll.u32 %v3222_v62, 16  ;;  %2881 = vmatmul.mubr.msk.bf16.gmra.mxu1 %vm434_vm1, %v3245_v16  ;;  %v295_v25 = vshll.u32 %v3239_v8, 16  ;;  %v300_v4 = vshrl.u32 %v3225_v63, 16 }
  0x1f   : > { %v279_v10 = vrot.slane %v278_v61, 4  ;;  %v3250_v20 = vcombine.low %v256_v59, %v270_v9  ;;  %v303_v29 = vshll.u32 %v3225_v63, 16  ;;  %v288_v31 = vrot.slane %v286_v22, 4  ;;  %2896 = vmatprep.mubr.msk.bf16.mxu1 %vm434_vm1, %v3229_v2  ;;  %v2680_v61 = vld [vmem:[%s4259_s1 + $0x1c] sm:$0xf] }
  0x20   : > { %v291_v32 = vrot.slane %v289_v23, 5  ;;  %v309_v33 = vshll.u32 %v3248_v19, 16  ;;  %v302_v37 = vrot.slane %v300_v4, 4  ;;  %v314_v39 = vshrl.u32 %v3236_v5, 16 }
  0x21   : > { %v284_v30 = vsel %vm3202_vm4, %v279_v10, %v283_v0  ;;  %2867 = vmatmul.mubr.msk.bf16.vlgmr.msra.gmra.mxu0 %vm434_vm1, %v3250_v20  ;;  %v305_v38 = vrot.slane %v303_v29, 5  ;;  %v297_v42 = vrot.slane %v295_v25, 5  ;;  %v317_v43 = vshll.u32 %v3236_v5, 16 }
  0x22   : > { %v3283_v35 = vcombine.low %v270_v9, %v284_v30  ;;  %2885 = vmatpush3.bf16.msra.mxu0 %v626_v21  ;;  %v292_v40 = vor.u32 %v291_v32, %v288_v31  ;;  %v323_v44 = vshll.u32 %v3269_v26, 16  ;;  %v311_v47 = vrot.slane %v309_v33, 5  ;;  %v3333_v32 = vld [vmem:[%s3145_s25 + $0x48] sm:$0xf]  ;;  %v211_v33 = vld [vmem:[%s3145_s25 + $0x4c] sm:$0x1] }
  0x23   : > { %3028 = vmatprep.subr.msk.bf16.mxu0 %vm447_vm0, %v3263_v24  ;;  %v306_v46 = vor.u32 %v305_v38, %v302_v37  ;;  %v316_v48 = vrot.slane %v314_v39, 4  ;;  %v379_v49 = vshrl.u32 %v3281_v34, 16  ;;  %v319_v51 = vrot.slane %v317_v43, 5  ;;  %s2782_s25 = sshll.u32 %s4267_s13, 6 }
  0x24   : > { %v293_v50 = vrot.slane %v292_v40, 4  ;;  %v382_v52 = vshll.u32 %v3281_v34, 16  ;;  %v922_v54 = vsel %vm447_vm0, %v3181_v18, 0  ;;  %v388_v56 = vshll.u32 %v3291_v45, 16  ;;  %s3571_s28 = scalar_lea.vmem %s4260_s2, %s2782_s25  ;;  %s4119_s6 = scalar_lea.vmem %s4261_s3, %s2782_s25 }
  0x25   : > { %v307_v53 = vrot.slane %v306_v46, 4  ;;  %v381_v55 = vrot.slane %v379_v49, 4  ;;  %v320_v58 = vor.u32 %v319_v51, %v316_v48  ;;  %v325_v59 = vrot.slane %v323_v44, 5 }
  0x26   : > { %v298_v57 = vsel %vm3202_vm4, %v293_v50, %v297_v42  ;;  %v384_v60 = vrot.slane %v382_v52, 5  ;;  %2897 = vmatmul.mubr.msk.bf16.vlgmr.msra.gmra.mxu1 %vm434_vm1, %v3283_v35  ;;  %v390_v22 = vrot.slane %v388_v56, 5  ;;  %v3318_v25 = vcombine.low %v3151_v7, %v3158_v11  ;;  %v2705_v56 = vld [vmem:[%s4259_s1 + $0x20] sm:$0xf] }
  0x27   : > { %v3303_v0 = vcombine.low %v284_v30, %v298_v57  ;;  %v312_v9 = vsel %vm3202_vm4, %v307_v53, %v311_v47  ;;  %v321_v18 = vrot.slane %v320_v58, 4  ;;  %2915 = vmatpush3.bf16.msra.mxu1 %v922_v54  ;;  %v2635_v37 = vrot.slane %v3148_v6, 9 }
  0x28   : > { %v3309_v10 = vcombine.low %v298_v57, %v312_v9  ;;  %v385_v21 = vor.u32 %v384_v60, %v381_v55  ;;  %3031 = vmatprep.subr.msk.bf16.mxu1 %vm447_vm0, %v2680_v61  ;;  %v348_v38 = vrot.slane %v3168_v14, 5  ;;  %v352_v39 = vrot.slane %v3171_v15, 5 }
  0x29   : > { %2870 = vmatprep.mubr.msk.bf16.mxu0 %vm434_vm1, %v3303_v0  ;;  %v326_v23 = vsel %vm3202_vm4, %v321_v18, %v325_v59  ;;  %v854_v40 = vsel %vm447_vm0, %v3263_v24, 0  ;;  %v3347_v42 = vcombine.low %v3161_v12, %v3195_v28  ;;  %v3351_v43 = vcombine.low %v3222_v62, %v3225_v63 }
  0x2a   : > { %2900 = vmatprep.mubr.msk.bf16.mxu1 %vm434_vm1, %v3309_v10  ;;  %v386_v4 = vrot.slane %v385_v21, 4  ;;  %v3322_v29 = vcombine.low %v312_v9, %v326_v23  ;;  %v399_v6 = vshrl.u32 %v3333_v32, 16  ;;  %v402_v14 = vshll.u32 %v3333_v32, 16 }
  0x2b   : > { %v2643_v15 = vrot.slane %v3281_v34, 9  ;;  %v396_v44 = vrot.slane %v3291_v45, 5  ;;  %v408_v24 = vshll.u32 %v211_v33, 16  ;;  %v2636_v46 = vrot.slane %v3151_v7, 9  ;;  %v2679_v45 = vld [vmem:[%s4259_s1 + $0x18] sm:$0xf] }
  0x2c   : > { %v391_v30 = vsel %vm3202_vm4, %v386_v4, %v390_v22  ;;  %2871 = vmatmul.mubr.msk.bf16.gmra.mxu0 %vm434_vm1, %v3322_v29  ;;  %v401_v47 = vrot.slane %v399_v6, 4  ;;  %v404_v48 = vrot.slane %v402_v14, 5  ;;  %v2644_v49 = vrot.slane %v3333_v32, 9 }
  0x2d   : > { %v3328_v31 = vcombine.low %v326_v23, %v391_v30  ;;  %2886 = vmatprep.mubr.msk.bf16.mxu0 %vm434_vm1, %v3318_v25  ;;  %v416_v51 = vrot.slane %v211_v33, 5  ;;  %v1083_v7 = vsel %vm447_vm0, %v2680_v61, 0  ;;  %v410_v53 = vrot.slane %v408_v24, 5  ;;  %v2708_v24 = vld [vmem:[%s4259_s1 + $0x2c] sm:$0xf] }
  0x2e   : > { %v405_v52 = vor.u32 %v404_v48, %v401_v47  ;;  %v2637_v54 = vrot.slane %v3158_v11, 9  ;;  %v356_v55 = vrot.slane %v3176_v17, 5  ;;  %v3382_v57 = vsel %vm3363_vm7, %v2643_v15, %v396_v44 }
  0x2f   : > { %2901 = vmatmul.mubr.msk.bf16.gmra.mxu1 %vm434_vm1, %v3328_v31  ;;  %v3386_v58 = vsel %vm3363_vm7, %v2644_v49, %v416_v51  ;;  %v349_v11 = vsel %vm3363_vm7, %v2635_v37, %v348_v38  ;;  %v353_v17 = vsel %vm3363_vm7, %v2636_v46, %v352_v39  ;;  %v2638_v61 = vrot.slane %v3161_v12, 9  ;;  %v2707_v49 = vld [vmem:[%s4259_s1 + $0x28] sm:$0xf]  ;;  %v2730_v51 = vld [vmem:[%s4259_s1 + $0x3c] sm:$0xf] }
  0x30   : > { %2916 = vmatprep.mubr.msk.bf16.mxu1 %vm434_vm1, %v3227_v1  ;;  %v2717_v1 = vcombine.low %v3281_v34, %v3333_v32  ;;  %v406_v59 = vrot.slane %v405_v52, 4  ;;  %v2743_v60 = vcombine.low %v3382_v57, %v3386_v58  ;;  %v2664_v9 = vcombine.low %v3236_v5, %v3281_v34  ;;  %v2729_v52 = vld [vmem:[%s4259_s1 + $0x38] sm:$0xf]  ;;  %v3064_v34 = vld [vmem:[%s3571_s28 + $0x28] ss:$0 sps:$4 sm:$0xff]  }
  0x31   : > { %v357_v21 = vsel %vm3363_vm7, %v2637_v54, %v356_v55  ;;  %v360_v22 = vrot.slane %v3192_v27, 5  ;;  %v2681_v23 = vcombine.low %v349_v11, %v353_v17  ;;  %v2639_v33 = vrot.slane %v3195_v28, 9  ;;  %v3070_v32 = vld [vmem:[%s3571_s28 + $0x1c] ss:$0 sps:$4 sm:$0xff]   ;;  %v3072_v54 = vld [vmem:[%s3571_s28 + $0x2c] ss:$0 sps:$4 sm:$0xff]  }
  0x32   : > { %v411_v18 = vsel %vm3202_vm4, %v406_v59, %v410_v53  ;;  %v364_v12 = vrot.slane %v3209_v41, 5  ;;  %v2640_v37 = vrot.slane %v3222_v62, 9  ;;  %v368_v38 = vrot.slane %v3239_v8, 5  ;;  %v3073_v55 = vld [vmem:[%s3571_s28 + $0x24] ss:$0 sps:$4 sm:$0xff]  }
  0x33   : > { %v3408_v4 = vcombine.low %v391_v30, %v411_v18  ;;  %v3414_v39 = vcombine.low %v353_v17, %v357_v21  ;;  %v361_v36 = vsel %vm3363_vm7, %v2638_v61, %v360_v22  ;;  %v2641_v41 = vrot.slane %v3225_v63, 9 }
  0x34   : > { %2887 = vmatmul.mubr.msk.bf16.vlgmr.msra.gmra.mxu0 %vm434_vm1, %v3347_v42  ;;  %v365_v27 = vsel %vm3363_vm7, %v2639_v33, %v364_v12  ;;  %v369_v28 = vsel %vm3363_vm7, %v2640_v37, %v368_v38  ;;  %v372_v62 = vrot.slane %v3248_v19, 5  ;;  %v3430_v8 = vcombine.low %v357_v21, %v361_v36  ;;  %v2706_v19 = vld [vmem:[%s4259_s1 + $0x24] sm:$0xf] }
  0x35   : > { %2905 = vmatpush3.bf16.msra.mxu0 %v854_v40  ;;  %2890 = vmatprep.mubr.msk.bf16.mxu0 %vm434_vm1, %v3351_v43  ;;  %v3432_v30 = vcombine.low %v365_v27, %v369_v28  ;;  %v2642_v40 = vrot.slane %v3236_v5, 9  ;;  %v376_v6 = vrot.slane %v3269_v26, 5  ;;  %v990_v14 = vsel %vm447_vm0, %v2679_v45, 0 }
  0x36   : > { %3030 = vmatprep.subr.msk.bf16.mxu0 %vm447_vm0, %v2679_v45  ;;  %v3437_v15 = vcombine.low %v361_v36, %v365_v27  ;;  %v373_v63 = vsel %vm3363_vm7, %v2641_v41, %v372_v62  ;;  %v1263_v5 = vsel %vm447_vm0, %v2705_v56, 0  ;;  %v1195_v48 = vsel %vm447_vm0, %v2706_v19, 0  ;;  %v2727_v45 = vld [vmem:[%s4259_s1 + $0x30] sm:$0xf] }
  0x37   : > { %2917 = vmatmul.mubr.msk.bf16.vlgmr.msra.gmra.mxu1 %vm434_vm1, %v3250_v20  ;;  %v3444_v44 = vcombine.low %v369_v28, %v373_v63  ;;  %v377_v26 = vsel %vm3363_vm7, %v2642_v40, %v376_v6  ;;  %v1417_v50 = vsel %vm447_vm0, %v2708_v24, 0  ;;  %v1746_v53 = vsel %vm447_vm0, %v2730_v51, 0 }
  0x38   : > { %2935 = vmatpush3.bf16.msra.mxu1 %v1083_v7  ;;  %2920 = vmatprep.mubr.msk.bf16.mxu1 %vm434_vm1, %v3303_v0  ;;  %v2684_v46 = vcombine.low %v373_v63, %v377_v26  ;;  %v2700_v47 = vcombine.low %v377_v26, %v3382_v57  ;;  %v3075_v57 = vld [vmem:[%s3571_s28 + $0x34] ss:$0 sps:$4 sm:$0xff]  }
  0x39   : > { %3033 = vmatprep.subr.msk.bf16.mxu1 %vm447_vm0, %v2705_v56  ;;  %v3074_v56 = vld [vmem:[%s3571_s28 + $0x3c] ss:$0 sps:$4 sm:$0xff]  }
  0x3c   : > { %2891 = vmatmul.mubr.msk.bf16.gmra.mxu0 %vm434_vm1, %v2664_v9 }
  0x3d   : > { %2906 = vmatprep.mubr.msk.bf16.mxu0 %vm434_vm1, %v2681_v23 }
  0x3f   : > { %2921 = vmatmul.mubr.msk.bf16.gmra.mxu1 %vm434_vm1, %v3322_v29 }
  0x40   : > { %2936 = vmatprep.mubr.msk.bf16.mxu1 %vm434_vm1, %v3414_v39 }
  0x44   : > { %2907 = vmatmul.mubr.msk.bf16.vlgmr.msra.gmra.mxu0 %vm434_vm1, %v3430_v8 }
  0x45   : > { %2925 = vmatpush3.bf16.msra.mxu0 %v990_v14  ;;  %2910 = vmatprep.mubr.msk.bf16.mxu0 %vm434_vm1, %v3432_v30 }
  0x46   : > { %3032 = vmatprep.subr.msk.bf16.mxu0 %vm447_vm0, %v2706_v19 }
  0x47   : > { %2937 = vmatmul.mubr.msk.bf16.vlgmr.msra.gmra.mxu1 %vm434_vm1, %v3437_v15 }
  0x48   : > { %2955 = vmatpush3.bf16.msra.mxu1 %v1263_v5  ;;  %2940 = vmatprep.mubr.msk.bf16.mxu1 %vm434_vm1, %v3444_v44 }
  0x49   : > { %3035 = vmatprep.subr.msk.bf16.mxu1 %vm447_vm0, %v2708_v24 }
  0x4c   : > { %2911 = vmatmul.mubr.msk.bf16.gmra.mxu0 %vm434_vm1, %v2684_v46 }
  0x4d   : > { %2926 = vmatprep.mubr.msk.bf16.mxu0 %vm434_vm1, %v3229_v2 }
  0x4f   : > { %2941 = vmatmul.mubr.msk.bf16.gmra.mxu1 %vm434_vm1, %v2700_v47 }
  0x50   : > { %2956 = vmatprep.mubr.msk.bf16.mxu1 %vm434_vm1, %v3318_v25  ;;  %v1336_v25 = vsel %vm447_vm0, %v2707_v49, 0 }
  0x54   : > { %2927 = vmatmul.mubr.msk.bf16.vlgmr.msra.gmra.mxu0 %vm434_vm1, %v3283_v35 }
  0x55   : > { %2945 = vmatpush3.bf16.msra.mxu0 %v1195_v48  ;;  %2930 = vmatprep.mubr.msk.bf16.mxu0 %vm434_vm1, %v3309_v10 }
  0x56   : > { %3034 = vmatprep.subr.msk.bf16.mxu0 %vm447_vm0, %v2707_v49 }
  0x57   : > { %2957 = vmatmul.mubr.msk.bf16.vlgmr.msra.gmra.mxu1 %vm434_vm1, %v3347_v42  ;;  %v2728_v42 = vld [vmem:[%s4259_s1 + $0x34] sm:$0xf] }
  0x58   : > { %2975 = vmatpush3.bf16.msra.mxu1 %v1417_v50  ;;  %2960 = vmatprep.mubr.msk.bf16.mxu1 %vm434_vm1, %v3351_v43  ;;  %v1597_v43 = vsel %vm447_vm0, %v2727_v45, 0  ;;  %v1529_v7 = vsel %vm447_vm0, %v2728_v42, 0 }
  0x59   : > { %3037 = vmatprep.subr.msk.bf16.mxu1 %vm447_vm0, %v2727_v45 }
  0x5c   : > { %2931 = vmatmul.mubr.msk.bf16.gmra.mxu0 %vm434_vm1, %v3328_v31 }
  0x5d   : > { %2946 = vmatprep.mubr.msk.bf16.mxu0 %vm434_vm1, %v3229_v2 }
  0x5f   : > { %2961 = vmatmul.mubr.msk.bf16.gmra.mxu1 %vm434_vm1, %v2664_v9 }
  0x60   : > { %2976 = vmatprep.mubr.msk.bf16.mxu1 %vm434_vm1, %v3250_v20 }
  0x64   : > { %2947 = vmatmul.mubr.msk.bf16.vlgmr.msra.gmra.mxu0 %vm434_vm1, %v3283_v35 }
  0x65   : > { %2965 = vmatpush3.bf16.msra.mxu0 %v1336_v25  ;;  %2950 = vmatprep.mubr.msk.bf16.mxu0 %vm434_vm1, %v3309_v10 }
  0x66   : > { %3036 = vmatprep.subr.msk.bf16.mxu0 %vm447_vm0, %v2728_v42 }
  0x67   : > { %2977 = vmatmul.mubr.msk.bf16.vlgmr.msra.gmra.mxu1 %vm434_vm1, %v3303_v0 }
  0x68   : > { %2995 = vmatpush3.bf16.msra.mxu1 %v1597_v43  ;;  %2980 = vmatprep.mubr.msk.bf16.mxu1 %vm434_vm1, %v3322_v29 }
  0x69   : > { %3039 = vmatprep.subr.msk.bf16.mxu1 %vm447_vm0, %v2730_v51 }
  0x6c   : > { %2951 = vmatmul.mubr.msk.bf16.gmra.mxu0 %vm434_vm1, %v3328_v31 }
  0x6d   : > { %2966 = vmatprep.mubr.msk.bf16.mxu0 %vm434_vm1, %v3165_v13  ;;  %v1665_v13 = vsel %vm447_vm0, %v2729_v52, 0 }
  0x6f   : > { %2981 = vmatmul.mubr.msk.bf16.gmra.mxu1 %vm434_vm1, %v3408_v4 }
  0x70   : > { %2996 = vmatprep.mubr.msk.bf16.mxu1 %vm434_vm1, %v3229_v2  ;;  %v3060_v2 = vld [vmem:[%s3571_s28 + $0x10] ss:$0 sps:$4 sm:$0xff]  }
  0x71   : > { %2157 = vrot.lane.b32.xlu1 %v3060_v2, %s3088_s29 }
  0x74   : > { %2967 = vmatmul.mubr.msk.bf16.vlgmr.msra.gmra.mxu0 %vm434_vm1, %v3233_v3  ;;  %v3061_v3 = vld [vmem:[%s3571_s28] ss:$0 sps:$4 sm:$0xff]  }
  0x75   : > { %2985 = vmatpush3.bf16.msra.mxu0 %v1529_v7  ;;  %2970 = vmatprep.mubr.msk.bf16.mxu0 %vm434_vm1, %v3245_v16  ;;  %v3062_v16 = vld [vmem:[%s3571_s28 + $0x18] ss:$0 sps:$4 sm:$0xff]  }
  0x76   : > { %3038 = vmatprep.subr.msk.bf16.mxu0 %vm447_vm0, %v2729_v52  ;;  %2153 = vrot.lane.b32.xlu0 %v3061_v3, %s3088_s29 }
  0x77   : > { %2997 = vmatmul.mubr.msk.bf16.vlgmr.msra.gmra.mxu1 %vm434_vm1, %v3283_v35  ;;  %2159 = vrot.lane.b32.xlu1 %v3062_v16, %s3088_s29  ;;  %v3065_v35 = vld [vmem:[%s3571_s28 + $0x20] ss:$0 sps:$4 sm:$0xff]  }
  0x78   : > { %3015 = vmatpush3.bf16.msra.mxu1 %v1746_v53  ;;  %3000 = vmatprep.mubr.msk.bf16.mxu1 %vm434_vm1, %v3309_v10  ;;  %v3067_v10 = vld [vmem:[%s3571_s28 + $0x30] ss:$0 sps:$4 sm:$0xff]  }
  0x7b   : > { %2163 = vrot.lane.b32.xlu1 %v3064_v34, %s3088_s29 }
  0x7c   : > { %2971 = vmatmul.mubr.msk.bf16.gmra.mxu0 %vm434_vm1, %v2717_v1  ;;  %v3071_v1 = vld [vmem:[%s3571_s28 + $0x14] ss:$0 sps:$4 sm:$0xff]  }
  0x7d   : > { %2986 = vmatprep.mubr.msk.bf16.mxu0 %vm434_vm1, %v3414_v39 }
  0x7f   : > { %3001 = vmatmul.mubr.msk.bf16.gmra.mxu1 %vm434_vm1, %v3328_v31  ;;  %v3069_v31 = vld [vmem:[%s3571_s28 + $0x4] ss:$0 sps:$4 sm:$0xff]  }
  0x80   : > { %3016 = vmatprep.mubr.msk.bf16.mxu1 %vm434_vm1, %v3430_v8 }
  0x84   : > { %2987 = vmatmul.mubr.msk.bf16.vlgmr.msra.gmra.mxu0 %vm434_vm1, %v3437_v15 }
  0x85   : > { %3005 = vmatpush3.bf16.msra.mxu0 %v1665_v13  ;;  %2990 = vmatprep.mubr.msk.bf16.mxu0 %vm434_vm1, %v3444_v44 }
  0x87   : > { %3017 = vmatmul.mubr.msk.bf16.vlgmr.msra.gmra.mxu1 %vm434_vm1, %v3432_v30 }
  0x88   : > { %3020 = vmatprep.mubr.msk.bf16.mxu1 %vm434_vm1, %v2684_v46 }
  0x8c   : > { %2991 = vmatmul.mubr.msk.bf16.gmra.mxu0 %vm434_vm1, %v2700_v47 }
  0x8d   : > { %3006 = vmatprep.mubr.msk.bf16.mxu0 %vm434_vm1, %v3250_v20  ;;  %v3063_v20 = vld [vmem:[%s3571_s28 + $0x8] ss:$0 sps:$4 sm:$0xff]  }
  0x8e   : > { %2155 = vrot.lane.b32.xlu0 %v3063_v20, %s3088_s29 }
  0x8f   : > { %3021 = vmatmul.mubr.msk.bf16.gmra.mxu1 %vm434_vm1, %v2743_v60 }
  0x92   : > { %2161 = vrot.lane.b32.xlu0 %v3065_v35, %s3088_s29 }
  0x94   : > { %3007 = vmatmul.mubr.msk.bf16.vlgmr.msra.gmra.mxu0 %vm434_vm1, %v3303_v0  ;;  %v3066_v0 = vld [vmem:[%s3571_s28 + $0x38] ss:$0 sps:$4 sm:$0xff]  }
  0x95   : > { %3010 = vmatprep.mubr.msk.bf16.mxu0 %vm434_vm1, %v3322_v29  ;;  %2167 = vrot.lane.b32.xlu1 %v3066_v0, %s3088_s29  ;;  %v3068_v29 = vld [vmem:[%s3571_s28 + $0xc] ss:$0 sps:$4 sm:$0xff]  }
  0x96   : > { %2165 = vrot.lane.b32.xlu0 %v3067_v10, %s3088_s29 }
  0x99   : > { %2195 = vrot.lane.b32.xlu1 %v3063_v20, %s3089_s30 }
  0x9a   : > { %2193 = vrot.lane.b32.xlu0 %v3061_v3, %s3089_s30 }
  0x9c   : > { %3011 = vmatmul.mubr.msk.bf16.gmra.mxu0 %vm434_vm1, %v3408_v4 }
  0x9d   : > { %2431 = vrot.lane.b32.xlu1 %v3068_v29, %s3088_s29 }
  0x9e   : > { %2429 = vrot.lane.b32.xlu0 %v3069_v31, %s3088_s29 }
  0xa1   : > { %2435 = vrot.lane.b32.xlu1 %v3070_v32, %s3088_s29 }
  0xa2   : > { %2433 = vrot.lane.b32.xlu0 %v3071_v1, %s3088_s29 }
  0xa5   : > { %2439 = vrot.lane.b32.xlu1 %v3072_v54, %s3088_s29 }
  0xa6   : > { %2437 = vrot.lane.b32.xlu0 %v3073_v55, %s3088_s29 }
  0xa9   : > { %2443 = vrot.lane.b32.xlu1 %v3074_v56, %s3088_s29 }
  0xaa   : > { %2441 = vrot.lane.b32.xlu0 %v3075_v57, %s3088_s29 }
  0xad   : > { %2199 = vrot.lane.b32.xlu1 %v3062_v16, %s3089_s30 }
  0xae   : > { %2197 = vrot.lane.b32.xlu0 %v3060_v2, %s3089_s30 }
  0xb1   : > { %2203 = vrot.lane.b32.xlu1 %v3064_v34, %s3089_s30 }
  0xb2   : > { %2201 = vrot.lane.b32.xlu0 %v3065_v35, %s3089_s30 }
  0xb5   : > { %2207 = vrot.lane.b32.xlu1 %v3066_v0, %s3089_s30 }
  0xb6   : > { %2205 = vrot.lane.b32.xlu0 %v3067_v10, %s3089_s30 }
  0xb9   : > { %2471 = vrot.lane.b32.xlu1 %v3068_v29, %s3089_s30 }
  0xba   : > { %2469 = vrot.lane.b32.xlu0 %v3069_v31, %s3089_s30 }
  0xbd   : > { %2475 = vrot.lane.b32.xlu1 %v3070_v32, %s3089_s30 }
  0xbe   : > { %2473 = vrot.lane.b32.xlu0 %v3071_v1, %s3089_s30 }
  0xc1   : > { %2479 = vrot.lane.b32.xlu1 %v3072_v54, %s3089_s30 }
  0xc2   : > { %2477 = vrot.lane.b32.xlu0 %v3073_v55, %s3089_s30 }
  0xd4   : > { %v2878_v58 = vpop.f32.mrf.mxu1 }
  0xd6   : > { %v577_v11 = vpop.f32.mrf.mxu1 }
  0xd8   : > { %v2879_v17 = vpop.f32.mrf.mxu1 }
  0xda   : > { %v580_v59 = vpop.f32.mrf.mxu1 }
  0xde   : > { %v2882_v60 = vpop.f32.mrf.mxu1 }
  0xe0   : > { %v593_v9 = vpop.f32.mrf.mxu1 }
  0xe1   : > { %v2868_v61 = vpop.f32.mrf.mxu0 }
  0xe2   : > { %v2883_v21 = vpop.f32.mrf.mxu1  ;;  %v586_v30 = vadd.f32 %v2878_v58, %v2868_v61 }
  0xe3   : > { %v485_v18 = vpop.f32.mrf.mxu0 }
  0xe4   : > { %v596_v23 = vpop.f32.mrf.mxu1  ;;  %v578_v14 = vadd.f32 %v577_v11, %v485_v18 }
  0xe5   : > { %v2869_v22 = vpop.f32.mrf.mxu0 }
  0xe6   : > { %v2898_v4 = vpop.f32.mrf.mxu1  ;;  %v589_v44 = vadd.f32 %v2879_v17, %v2869_v22 }
  0xe7   : > { %v488_v33 = vpop.f32.mrf.mxu0 }
  0xe8   : > { %v755_v12 = vpop.f32.mrf.mxu1  ;;  %v581_v47 = vadd.f32 %v580_v59, %v488_v33 }
  0xea   : > { %v2899_v37 = vpop.f32.mrf.mxu1 }
  0xec   : > { %v2872_v38 = vpop.f32.mrf.mxu0  ;;  %v758_v39 = vpop.f32.mrf.mxu1 }
  0xed   : > { %v602_v25 = vadd.f32 %v2882_v60, %v2872_v38 }
  0xee   : > { %v501_v36 = vpop.f32.mrf.mxu0 }
  0xef   : > { %v2902_v27 = vpop.f32.mrf.mxu1  ;;  %v594_v52 = vadd.f32 %v593_v9, %v501_v36 }
  0xf0   : > { %v2873_v28 = vpop.f32.mrf.mxu0 }
  0xf1   : > { %v771_v41 = vpop.f32.mrf.mxu1  ;;  %v605_v2 = vadd.f32 %v2883_v21, %v2873_v28 }
  0xf2   : > { %v504_v62 = vpop.f32.mrf.mxu0 }
  0xf3   : > { %v2903_v8 = vpop.f32.mrf.mxu1  ;;  %v597_v32 = vadd.f32 %v596_v23, %v504_v62 }
  0xf4   : > { %v2888_v40 = vpop.f32.mrf.mxu0 }
  0xf5   : > { %v774_v6 = vpop.f32.mrf.mxu1  ;;  %v695_v15 = vadd.f32 %v2888_v40, %v586_v30 }
  0xf6   : > { %v662_v63 = vpop.f32.mrf.mxu0 }
  0xf7   : > { %v3619_v19 = vpop.f32.mrf.mxu1  ;;  %v788_v5 = vadd.f32 %v2898_v4, %v695_v15  ;;  %v693_v26 = vadd.f32 %v662_v63, %v578_v14 }
  0xf8   : > { %v2889_v24 = vpop.f32.mrf.mxu0 }
  0xf9   : > { %v3621_v46 = vpop.f32.mrf.mxu1  ;;  %818 = vst.msk [vmem:[#allocation2 + $0x10] sm:$0xff] %vm434_vm1, %v788_v5  ;;  %v786_v48 = vadd.f32 %v755_v12, %v693_v26  ;;  %v696_v49 = vadd.f32 %v2889_v24, %v589_v44  ;;  %v797_v1 = vsel %vm434_vm1, %v788_v5, 0.0 }
  0xfa   : > { %v665_v50 = vpop.f32.mrf.mxu0 }
  0xfb   : > { %v3624_v45 = vpop.f32.mrf.mxu1  ;;  %816 = vst.msk [vmem:[#allocation2] sm:$0xff] %vm434_vm1, %v786_v48  ;;  %v789_v42 = vadd.f32 %v2899_v37, %v696_v49  ;;  %v694_v43 = vadd.f32 %v665_v50, %v581_v47  ;;  %v794_v20 = vsel %vm434_vm1, %v786_v48, 0.0 }
  0xfc   : > { %v2892_v51 = vpop.f32.mrf.mxu0 }
  0xfd   : > { %v3627_v7 = vpop.f32.mrf.mxu1  ;;  %819 = vst.msk [vmem:[#allocation2 + $0x18] sm:$0xff] %vm434_vm1, %v789_v42  ;;  %v787_v53 = vadd.f32 %v758_v39, %v694_v43  ;;  %v699_v13 = vadd.f32 %v2892_v51, %v602_v25  ;;  %v799_v11 = vsel %vm434_vm1, %v789_v42, 0.0 }
  0xfe   : > { %v678_v3 = vpop.f32.mrf.mxu0 }
  0xff   : > { %v3630_v16 = vpop.f32.mrf.mxu1  ;;  %v795_v34 = vsel %vm434_vm1, %v787_v53, 0.0  ;;  %817 = vst.msk [vmem:[#allocation2 + $0x8] sm:$0xff] %vm434_vm1, %v787_v53  ;;  %v792_v35 = vadd.f32 %v2902_v27, %v699_v13  ;;  %v697_v0 = vadd.f32 %v678_v3, %v594_v52 }
 0x100   : > { %v796_v10 = vadd.f32 %v795_v34, %v794_v20  ;;  %v2893_v29 = vpop.f32.mrf.mxu0 }
 0x101   : > { %v3635_v31 = vpop.f32.mrf.mxu1  ;;  %822 = vst.msk [vmem:[#allocation2 + $0x30] sm:$0xff] %vm434_vm1, %v792_v35  ;;  %v790_v54 = vadd.f32 %v771_v41, %v697_v0  ;;  %v700_v55 = vadd.f32 %v2893_v29, %v605_v2  ;;  %v805_v39 = vsel %vm434_vm1, %v792_v35, 0.0 }
 0x102   : > { %v798_v56 = vadd.f32 %v797_v1, %v796_v10  ;;  %v681_v57 = vpop.f32.mrf.mxu0 }
 0x103   : > { %v2923_v58 = vpop.f32.mrf.mxu1  ;;  %820 = vst.msk [vmem:[#allocation2 + $0x20] sm:$0xff] %vm434_vm1, %v790_v54  ;;  %v793_v17 = vadd.f32 %v2903_v8, %v700_v55  ;;  %v698_v59 = vadd.f32 %v681_v57, %v597_v32  ;;  %v801_v18 = vsel %vm434_vm1, %v790_v54, 0.0 }
 0x104   : > { %v800_v60 = vadd.f32 %v799_v11, %v798_v56  ;;  %v2908_v61 = vpop.f32.mrf.mxu0 }
 0x105   : > { %v3641_v9 = vpop.f32.mrf.mxu1  ;;  %823 = vst.msk [vmem:[#allocation2 + $0x38] sm:$0xff] %vm434_vm1, %v793_v17  ;;  %v791_v21 = vadd.f32 %v774_v6, %v698_v59  ;;  %v807_v41 = vsel %vm434_vm1, %v793_v17, 0.0  ;;  %v967_v5 = vadd.f32 %v3619_v19, %v2908_v61 }
 0x106   : > { %v802_v22 = vadd.f32 %v801_v18, %v800_v60  ;;  %v890_v23 = vpop.f32.mrf.mxu0 }
 0x107   : > { %v2938_v4 = vpop.f32.mrf.mxu1  ;;  %v803_v33 = vsel %vm434_vm1, %v791_v21, 0.0  ;;  %821 = vst.msk [vmem:[#allocation2 + $0x28] sm:$0xff] %vm434_vm1, %v791_v21  ;;  %v959_v47 = vadd.f32 %v3621_v46, %v890_v23 }
 0x108   : > { %v804_v12 = vadd.f32 %v803_v33, %v802_v22  ;;  %v2909_v37 = vpop.f32.mrf.mxu0 }
 0x109   : > { %v1119_v38 = vpop.f32.mrf.mxu1  ;;  %v970_v25 = vadd.f32 %v3624_v45, %v2909_v37 }
 0x10a   : > { %v806_v36 = vadd.f32 %v805_v39, %v804_v12  ;;  %v893_v27 = vpop.f32.mrf.mxu0 }
 0x10b   : > { %v2939_v28 = vpop.f32.mrf.mxu1  ;;  %v962_v53 = vadd.f32 %v3627_v7, %v893_v27 }
 0x10c   : > { %v3649_v62 = vadd.f32 %v807_v41, %v806_v36  ;;  %v2912_v8 = vpop.f32.mrf.mxu0 }
 0x10d   : > { %v1122_v30 = vpop.f32.mrf.mxu1  ;;  %v983_v46 = vadd.f32 %v3630_v16, %v2912_v8 }
 0x10e   : > { %v906_v40 = vpop.f32.mrf.mxu0  ;;  %v809_v33 = vrot.slane %v3649_v62, 4 }
 0x10f   : > { %v2942_v6 = vpop.f32.mrf.mxu1  ;;  %v975_v0 = vadd.f32 %v3635_v31, %v906_v40 }
 0x110   : > { %v2913_v14 = vpop.f32.mrf.mxu0  ;;  %v810_v8 = vadd.f32 %v809_v33, %v3649_v62 }
 0x111   : > { %v1135_v15 = vpop.f32.mrf.mxu1  ;;  %v986_v29 = vadd.f32 %v2923_v58, %v2913_v14 }
 0x112   : > { %v909_v63 = vpop.f32.mrf.mxu0 }
 0x113   : > { %v2943_v44 = vpop.f32.mrf.mxu1  ;;  %v978_v31 = vadd.f32 %v3641_v9, %v909_v63 }
 0x114   : > { %v2928_v26 = vpop.f32.mrf.mxu0 }
 0x115   : > { %v1138_v24 = vpop.f32.mrf.mxu1  ;;  %v1059_v48 = vadd.f32 %v2928_v26, %v967_v5  ;;  %v811_v26 = vrot.slane %v810_v8, 2 }
 0x116   : > { %v1026_v49 = vpop.f32.mrf.mxu0 }
 0x117   : > { %v3653_v50 = vpop.f32.mrf.mxu1  ;;  %v1152_v42 = vadd.f32 %v2938_v4, %v1059_v48  ;;  %v1057_v43 = vadd.f32 %v1026_v49, %v959_v47 }
 0x118   : > { %v2929_v51 = vpop.f32.mrf.mxu0 }
 0x119   : > { %v3656_v52 = vpop.f32.mrf.mxu1  ;;  %1183 = vst.msk [vmem:[#allocation2 + $0x50] sm:$0xff] %vm434_vm1, %v1152_v42  ;;  %v1150_v19 = vadd.f32 %v1119_v38, %v1057_v43  ;;  %v1060_v13 = vadd.f32 %v2929_v51, %v970_v25  ;;  %v1161_v59 = vsel %vm434_vm1, %v1152_v42, 0.0  ;;  %v812_v43 = vadd.f32 %v811_v26, %v810_v8 }
 0x11a   : > { %v1029_v2 = vpop.f32.mrf.mxu0 }
 0x11b   : > { %v3660_v3 = vpop.f32.mrf.mxu1  ;;  %1181 = vst.msk [vmem:[#allocation2 + $0x40] sm:$0xff] %vm434_vm1, %v1150_v19  ;;  %v1153_v20 = vadd.f32 %v2939_v28, %v1060_v13  ;;  %v1058_v45 = vadd.f32 %v1029_v2, %v962_v53  ;;  %v1158_v54 = vsel %vm434_vm1, %v1150_v19, 0.0 }
 0x11c   : > { %v2932_v34 = vpop.f32.mrf.mxu0 }
 0x11d   : > { %v3664_v35 = vpop.f32.mrf.mxu1  ;;  %1184 = vst.msk [vmem:[#allocation2 + $0x58] sm:$0xff] %vm434_vm1, %v1153_v20  ;;  %v1151_v7 = vadd.f32 %v1122_v30, %v1058_v45  ;;  %v1063_v10 = vadd.f32 %v2932_v34, %v983_v46  ;;  %v1163_v22 = vsel %vm434_vm1, %v1153_v20, 0.0  ;;  %v813_v20 = vrot.slane %v812_v43, 1 }
 0x11e   : > { %v1042_v32 = vpop.f32.mrf.mxu0 }
 0x11f   : > { %v3668_v1 = vpop.f32.mrf.mxu1  ;;  %v1159_v16 = vsel %vm434_vm1, %v1151_v7, 0.0  ;;  %1182 = vst.msk [vmem:[#allocation2 + $0x48] sm:$0xff] %vm434_vm1, %v1151_v7  ;;  %v1156_v55 = vadd.f32 %v2942_v6, %v1063_v10  ;;  %v1061_v56 = vadd.f32 %v1042_v32, %v975_v0 }
 0x120   : > { %v1160_v57 = vadd.f32 %v1159_v16, %v1158_v54  ;;  %v2933_v11 = vpop.f32.mrf.mxu0 }
 0x121   : > { %v3673_v17 = vpop.f32.mrf.mxu1  ;;  %1187 = vst.msk [vmem:[#allocation2 + $0x70] sm:$0xff] %vm434_vm1, %v1156_v55  ;;  %v1154_v58 = vadd.f32 %v1135_v15, %v1061_v56  ;;  %v1064_v60 = vadd.f32 %v2933_v11, %v986_v29  ;;  %v1169_v14 = vsel %vm434_vm1, %v1156_v55, 0.0 }
 0x122   : > { %v1162_v61 = vadd.f32 %v1161_v59, %v1160_v57  ;;  %v1045_v18 = vpop.f32.mrf.mxu0  ;;  %v814_v57 = vadd.f32 %v813_v20, %v812_v43 }
 0x123   : > { %v3678_v21 = vpop.f32.mrf.mxu1  ;;  %1185 = vst.msk [vmem:[#allocation2 + $0x60] sm:$0xff] %vm434_vm1, %v1154_v58  ;;  %v1157_v23 = vadd.f32 %v2943_v44, %v1064_v60  ;;  %v1062_v4 = vadd.f32 %v1045_v18, %v978_v31  ;;  %v1165_v38 = vsel %vm434_vm1, %v1154_v58, 0.0 }
 0x124   : > { %v1164_v12 = vadd.f32 %v1163_v22, %v1162_v61  ;;  %v2948_v9 = vpop.f32.mrf.mxu0 }
 0x125   : > { %v3683_v37 = vpop.f32.mrf.mxu1  ;;  %1188 = vst.msk [vmem:[#allocation2 + $0x78] sm:$0xff] %vm434_vm1, %v1157_v23  ;;  %v1155_v39 = vadd.f32 %v1138_v24, %v1062_v4  ;;  %v1171_v5 = vsel %vm434_vm1, %v1157_v23, 0.0  ;;  %v1308_v46 = vadd.f32 %v3653_v50, %v2948_v9 }
 0x126   : > { %v1166_v36 = vadd.f32 %v1165_v38, %v1164_v12  ;;  %v1231_v27 = vpop.f32.mrf.mxu0 }
 0x127   : > { %v2978_v28 = vpop.f32.mrf.mxu1  ;;  %v1167_v41 = vsel %vm434_vm1, %v1155_v39, 0.0  ;;  %1186 = vst.msk [vmem:[#allocation2 + $0x68] sm:$0xff] %vm434_vm1, %v1155_v39  ;;  %v1300_v7 = vadd.f32 %v3656_v52, %v1231_v27 }
 0x128   : > { %v1168_v30 = vadd.f32 %v1167_v41, %v1166_v36  ;;  %v2949_v40 = vpop.f32.mrf.mxu0 }
 0x129   : > { %v1453_v6 = vpop.f32.mrf.mxu1  ;;  %v1311_v16 = vadd.f32 %v3660_v3, %v2949_v40 }
 0x12a   : > { %v1170_v15 = vadd.f32 %v1169_v14, %v1168_v30  ;;  %v1234_v63 = vpop.f32.mrf.mxu0 }
 0x12b   : > { %v2979_v44 = vpop.f32.mrf.mxu1  ;;  %v1303_v50 = vadd.f32 %v3664_v35, %v1234_v63 }
 0x12c   : > { %v1172_v24 = vadd.f32 %v1171_v5, %v1170_v15  ;;  %v2952_v47 = vpop.f32.mrf.mxu0 }
 0x12d   : > { %v1456_v48 = vpop.f32.mrf.mxu1  ;;  %v1324_v3 = vadd.f32 %v3668_v1, %v2952_v47 }
 0x12e   : > { %v1173_v49 = vrot.slane %v1172_v24, 4  ;;  %v1247_v25 = vpop.f32.mrf.mxu0 }
 0x12f   : > { %v2982_v42 = vpop.f32.mrf.mxu1  ;;  %v1316_v35 = vadd.f32 %v3673_v17, %v1247_v25 }
 0x130   : > { %v1174_v51 = vadd.f32 %v1173_v49, %v1172_v24  ;;  %v2953_v62 = vpop.f32.mrf.mxu0 }
 0x131   : > { %v1469_v53 = vpop.f32.mrf.mxu1  ;;  %v1327_v38 = vadd.f32 %v3678_v21, %v2953_v62 }
 0x132   : > { %v1175_v19 = vrot.slane %v1174_v51, 2  ;;  %v1250_v13 = vpop.f32.mrf.mxu0 }
 0x133   : > { %v2983_v2 = vpop.f32.mrf.mxu1  ;;  %v1319_v40 = vadd.f32 %v3683_v37, %v1250_v13 }
 0x134   : > { %v1176_v45 = vadd.f32 %v1175_v19, %v1174_v51  ;;  %v2968_v34 = vpop.f32.mrf.mxu0 }
 0x135   : > { %v1472_v0 = vpop.f32.mrf.mxu1  ;;  %v1405_v10 = vadd.f32 %v2968_v34, %v1308_v46 }
 0x136   : > { %v1177_v29 = vrot.slane %v1176_v45, 1  ;;  %v1372_v32 = vpop.f32.mrf.mxu0 }
 0x137   : > { %v3694_v54 = vpop.f32.mrf.mxu1  ;;  %v1486_v55 = vadd.f32 %v2978_v28, %v1405_v10  ;;  %v1403_v56 = vadd.f32 %v1372_v32, %v1300_v7 }
 0x138   : > { %v1178_v11 = vadd.f32 %v1177_v29, %v1176_v45  ;;  %v2969_v31 = vpop.f32.mrf.mxu0 }
 0x139   : > { %v3697_v59 = vpop.f32.mrf.mxu1  ;;  %1517 = vst.msk [vmem:[#allocation2 + $0x90] sm:$0xff] %vm434_vm1, %v1486_v55  ;;  %v1484_v58 = vadd.f32 %v1453_v6, %v1403_v56  ;;  %v1406_v52 = vadd.f32 %v2969_v31, %v1311_v16  ;;  %v1495_v6 = vsel %vm434_vm1, %v1486_v55, 0.0 }
 0x13a   : > { %v3701_v60 = vadd.f32 %v1178_v11, %v814_v57  ;;  %v1375_v61 = vpop.f32.mrf.mxu0 }
 0x13b   : > { %v3703_v18 = vpop.f32.mrf.mxu1  ;;  %1515 = vst.msk [vmem:[#allocation2 + $0x80] sm:$0xff] %vm434_vm1, %v1484_v58  ;;  %v1487_v22 = vadd.f32 %v2979_v44, %v1406_v52  ;;  %v1404_v23 = vadd.f32 %v1375_v61, %v1303_v50  ;;  %v1492_v1 = vsel %vm434_vm1, %v1484_v58, 0.0 }
 0x13c   : > { %v2972_v4 = vpop.f32.mrf.mxu0 }
 0x13d   : > { %v3707_v33 = vpop.f32.mrf.mxu1  ;;  %1518 = vst.msk [vmem:[#allocation2 + $0x98] sm:$0xff] %vm434_vm1, %v1487_v22  ;;  %v1485_v12 = vadd.f32 %v1456_v48, %v1404_v23  ;;  %v1409_v9 = vadd.f32 %v2972_v4, %v1324_v3  ;;  %v1497_v5 = vsel %vm434_vm1, %v1487_v22, 0.0 }
 0x13e   : > { %v1388_v39 = vpop.f32.mrf.mxu0 }
 0x13f   : > { %v3712_v36 = vpop.f32.mrf.mxu1  ;;  %v1493_v27 = vsel %vm434_vm1, %v1485_v12, 0.0  ;;  %1516 = vst.msk [vmem:[#allocation2 + $0x88] sm:$0xff] %vm434_vm1, %v1485_v12  ;;  %v1490_v28 = vadd.f32 %v2982_v42, %v1409_v9  ;;  %v1407_v41 = vadd.f32 %v1388_v39, %v1316_v35 }
 0x140   : > { %v1494_v8 = vadd.f32 %v1493_v27, %v1492_v1  ;;  %v2973_v30 = vpop.f32.mrf.mxu0 }
 0x141   : > { %v3717_v17 = vpop.f32.mrf.mxu1  ;;  %1521 = vst.msk [vmem:[#allocation2 + $0xb0] sm:$0xff] %vm434_vm1, %v1490_v28  ;;  %v1488_v21 = vadd.f32 %v1469_v53, %v1407_v41  ;;  %v1410_v14 = vadd.f32 %v2973_v30, %v1327_v38  ;;  %v1503_v13 = vsel %vm434_vm1, %v1490_v28, 0.0 }
 0x142   : > { %v1496_v15 = vadd.f32 %v1495_v6, %v1494_v8  ;;  %v1391_v63 = vpop.f32.mrf.mxu0 }
 0x143   : > { %v3003_v44 = vpop.f32.mrf.mxu1  ;;  %1519 = vst.msk [vmem:[#allocation2 + $0xa0] sm:$0xff] %vm434_vm1, %v1488_v21  ;;  %v1491_v26 = vadd.f32 %v2983_v2, %v1410_v14  ;;  %v1408_v24 = vadd.f32 %v1391_v63, %v1319_v40  ;;  %v1499_v37 = vsel %vm434_vm1, %v1488_v21, 0.0 }
 0x144   : > { %v1498_v47 = vadd.f32 %v1497_v5, %v1496_v15  ;;  %v2988_v48 = vpop.f32.mrf.mxu0 }
 0x145   : > { %v3724_v49 = vpop.f32.mrf.mxu1  ;;  %1522 = vst.msk [vmem:[#allocation2 + $0xb8] sm:$0xff] %vm434_vm1, %v1491_v26  ;;  %v1489_v25 = vadd.f32 %v1472_v0, %v1408_v24  ;;  %v1505_v20 = vsel %vm434_vm1, %v1491_v26, 0.0  ;;  %v1642_v57 = vadd.f32 %v3694_v54, %v2988_v48 }
 0x146   : > { %v1500_v42 = vadd.f32 %v1499_v37, %v1498_v47  ;;  %v1565_v43 = vpop.f32.mrf.mxu0 }
 0x147   : > { %v1501_v51 = vsel %vm434_vm1, %v1489_v25, 0.0  ;;  %1520 = vst.msk [vmem:[#allocation2 + $0xa8] sm:$0xff] %vm434_vm1, %v1489_v25  ;;  %v3018_v19 = vpop.f32.mrf.mxu1  ;;  %v1634_v58 = vadd.f32 %v3697_v59, %v1565_v43 }
 0x148   : > { %v1502_v62 = vadd.f32 %v1501_v51, %v1500_v42  ;;  %v2989_v53 = vpop.f32.mrf.mxu0 }
 0x149   : > { %v1782_v7 = vpop.f32.mrf.mxu1  ;;  %v1645_v22 = vadd.f32 %v3703_v18, %v2989_v53 }
 0x14a   : > { %v1504_v2 = vadd.f32 %v1503_v13, %v1502_v62  ;;  %v1568_v46 = vpop.f32.mrf.mxu0 }
 0x14b   : > { %v3019_v16 = vpop.f32.mrf.mxu1  ;;  %v1637_v38 = vadd.f32 %v3707_v33, %v1568_v46 }
 0x14c   : > { %v1506_v45 = vadd.f32 %v1505_v20, %v1504_v2  ;;  %v2992_v34 = vpop.f32.mrf.mxu0 }
 0x14d   : > { %v1785_v50 = vpop.f32.mrf.mxu1  ;;  %v1658_v59 = vadd.f32 %v3712_v36, %v2992_v34 }
 0x14e   : > { %v1507_v10 = vrot.slane %v1506_v45, 4  ;;  %v1581_v0 = vpop.f32.mrf.mxu0 }
 0x14f   : > { %v3022_v9 = vpop.f32.mrf.mxu1  ;;  %v1650_v30 = vadd.f32 %v3717_v17, %v1581_v0 }
 0x150   : > { %v1508_v29 = vadd.f32 %v1507_v10, %v1506_v45  ;;  %v2993_v32 = vpop.f32.mrf.mxu0 }
 0x151   : > { %v1798_v41 = vpop.f32.mrf.mxu1  ;;  %v1661_v6 = vadd.f32 %v3003_v44, %v2993_v32 }
 0x152   : > { %v1509_v55 = vrot.slane %v1508_v29, 2  ;;  %v1584_v56 = vpop.f32.mrf.mxu0 }
 0x153   : > { %v3023_v5 = vpop.f32.mrf.mxu1  ;;  %v1653_v24 = vadd.f32 %v3724_v49, %v1584_v56 }
 0x154   : > { %v1510_v11 = vadd.f32 %v1509_v55, %v1508_v29  ;;  %v3008_v31 = vpop.f32.mrf.mxu0 }
 0x155   : > { %v1734_v52 = vadd.f32 %v3008_v31, %v1642_v57  ;;  %v1801_v62 = vpop.f32.mrf.mxu1 }
 0x156   : > { %v1511_v61 = vrot.slane %v1510_v11, 1  ;;  %v1701_v3 = vpop.f32.mrf.mxu0 }
 0x157   : > { %v1815_v23 = vadd.f32 %v3018_v19, %v1734_v52  ;;  %v1732_v4 = vadd.f32 %v1701_v3, %v1634_v58 }
 0x158   : > { %v1512_v35 = vadd.f32 %v1511_v61, %v1510_v11  ;;  %v3009_v12 = vpop.f32.mrf.mxu0 }
 0x159   : > { %1846 = vst.msk [vmem:[#allocation2 + $0xd0] sm:$0xff] %vm434_vm1, %v1815_v23  ;;  %v1813_v54 = vadd.f32 %v1782_v7, %v1732_v4  ;;  %v1735_v39 = vadd.f32 %v3009_v12, %v1645_v22  ;;  %v1824_v17 = vsel %vm434_vm1, %v1815_v23, 0.0 }
 0x15a   : > { %v1513_v1 = vadd.f32 %v1512_v35, %v3701_v60  ;;  %v1704_v27 = vpop.f32.mrf.mxu0 }
 0x15b   : > { %1844 = vst.msk [vmem:[#allocation2 + $0xc0] sm:$0xff] %vm434_vm1, %v1813_v54  ;;  %v1816_v28 = vadd.f32 %v3019_v16, %v1735_v39  ;;  %v1733_v18 = vadd.f32 %v1704_v27, %v1637_v38  ;;  %v1821_v14 = vsel %vm434_vm1, %v1813_v54, 0.0 }
 0x15c   : > { %v3012_v8 = vpop.f32.mrf.mxu0 }
 0x15d   : > { %1847 = vst.msk [vmem:[#allocation2 + $0xd8] sm:$0xff] %vm434_vm1, %v1816_v28  ;;  %v1814_v33 = vadd.f32 %v1785_v50, %v1733_v18  ;;  %v1738_v40 = vadd.f32 %v3012_v8, %v1658_v59  ;;  %v1826_v25 = vsel %vm434_vm1, %v1816_v28, 0.0  ;;  %v1900_v28 = vld [vmem:[#allocation2 + $0x40] sm:$0xff]  ;;  %v1903_v8 = vld [vmem:[#allocation2 + $0x58] sm:$0xff] }
 0x15e   : > { %v1717_v21 = vpop.f32.mrf.mxu0 }
 0x15f   : > { %v1822_v60 = vsel %vm434_vm1, %v1814_v33, 0.0  ;;  %1845 = vst.msk [vmem:[#allocation2 + $0xc8] sm:$0xff] %vm434_vm1, %v1814_v33  ;;  %v1819_v36 = vadd.f32 %v3022_v9, %v1738_v40  ;;  %v1736_v15 = vadd.f32 %v1717_v21, %v1650_v30  ;;  %v1901_v30 = vld [vmem:[#allocation2 + $0x48] sm:$0xff] }
 0x160   : > { %v1823_v63 = vadd.f32 %v1822_v60, %v1821_v14  ;;  %v3013_v26 = vpop.f32.mrf.mxu0  ;;  %v1994_v56 = vld [vmem:[#allocation2 + $0xd0] sm:$0xff] }
 0x161   : > { %1850 = vst.msk [vmem:[#allocation2 + $0xf0] sm:$0xff] %vm434_vm1, %v1819_v36  ;;  %v1817_v47 = vadd.f32 %v1798_v41, %v1736_v15  ;;  %v1739_v44 = vadd.f32 %v3013_v26, %v1661_v6  ;;  %v1832_v46 = vsel %vm434_vm1, %v1819_v36, 0.0  ;;  %v1902_v41 = vld [vmem:[#allocation2 + $0x50] sm:$0xff]  ;;  %v1904_v6 = vld [vmem:[#allocation2 + $0x60] sm:$0xff]  ;;  %v1905_v26 = vld [vmem:[#allocation2 + $0x68] sm:$0xff] }
 0x162   : > { %v1825_v48 = vadd.f32 %v1824_v17, %v1823_v63  ;;  %v1720_v37 = vpop.f32.mrf.mxu0  ;;  %v1992_v11 = vld [vmem:[#allocation2 + $0xc0] sm:$0xff]  ;;  %v1856_v63 = vld [vmem:[#allocation2 + $0x10] sm:$0xff] }
 0x163   : > { %1848 = vst.msk [vmem:[#allocation2 + $0xe0] sm:$0xff] %vm434_vm1, %v1817_v47  ;;  %v1820_v42 = vadd.f32 %v3023_v5, %v1739_v44  ;;  %v1737_v43 = vadd.f32 %v1720_v37, %v1653_v24  ;;  %v1828_v53 = vsel %vm434_vm1, %v1817_v47, 0.0  ;;  %v1854_v15 = vld [vmem:[#allocation2] sm:$0xff]  ;;  %v1906_v5 = vld [vmem:[#allocation2 + $0x70] sm:$0xff]  ;;  %v1907_v37 = vld [vmem:[#allocation2 + $0x78] sm:$0xff] }
 0x164   : > { %v1827_v51 = vadd.f32 %v1826_v25, %v1825_v48  ;;  %v1995_v31 = vld [vmem:[#allocation2 + $0xd8] sm:$0xff] }
 0x165   : > { %1851 = vst.msk [vmem:[#allocation2 + $0xf8] sm:$0xff] %vm434_vm1, %v1820_v42  ;;  %v1818_v49 = vadd.f32 %v1801_v62, %v1737_v43  ;;  %v1834_v45 = vsel %vm434_vm1, %v1820_v42, 0.0  ;;  %v1857_v48 = vld [vmem:[#allocation2 + $0x18] sm:$0xff]  ;;  %v1858_v62 = vld [vmem:[#allocation2 + $0x20] sm:$0xff] }
 0x166   : > { %v1829_v19 = vadd.f32 %v1828_v53, %v1827_v51  ;;  %v1993_v50 = vld [vmem:[#allocation2 + $0xc8] sm:$0xff] }
 0x167   : > { %v1830_v13 = vsel %vm434_vm1, %v1818_v49, 0.0  ;;  %1849 = vst.msk [vmem:[#allocation2 + $0xe8] sm:$0xff] %vm434_vm1, %v1818_v49  ;;  %v1855_v51 = vld [vmem:[#allocation2 + $0x8] sm:$0xff]  ;;  %v1948_v49 = vld [vmem:[#allocation2 + $0x90] sm:$0xff] }
 0x168   : > { %v1831_v2 = vadd.f32 %v1830_v13, %v1829_v19  ;;  %v1946_v19 = vld [vmem:[#allocation2 + $0x80] sm:$0xff]  ;;  %v1947_v13 = vld [vmem:[#allocation2 + $0x88] sm:$0xff] }
 0x16a   : > { %v1833_v20 = vadd.f32 %v1832_v46, %v1831_v2  ;;  %v1996_v58 = vld [vmem:[#allocation2 + $0xe0] sm:$0xff] }
 0x16c   : > { %v1835_v34 = vadd.f32 %v1834_v45, %v1833_v20 }
 0x16e   : > { %v1836_v7 = vrot.slane %v1835_v34, 4  ;;  %v1997_v52 = vld [vmem:[#allocation2 + $0xe8] sm:$0xff] }
 0x170   : > { %v1837_v10 = vadd.f32 %v1836_v7, %v1835_v34 }
 0x172   : > { %v1838_v0 = vrot.slane %v1837_v10, 2 }
 0x174   : > { %v1839_v29 = vadd.f32 %v1838_v0, %v1837_v10  ;;  %v1859_v0 = vld [vmem:[#allocation2 + $0x28] sm:$0xff] }
 0x176   : > { %v1840_v32 = vrot.slane %v1839_v29, 1 }
 0x178   : > { %v1841_v16 = vadd.f32 %v1840_v32, %v1839_v29  ;;  %v1949_v32 = vld [vmem:[#allocation2 + $0x98] sm:$0xff] }
 0x17a   : > { %v1842_v55 = vadd.f32 %v1841_v16, %v1513_v1  ;;  %v1950_v16 = vld [vmem:[#allocation2 + $0xa0] sm:$0xff] }
 0x17c   : > { %v3756_v57 = vmul.f32 0.00390625, %v1842_v55  ;;  %v1951_v55 = vld [vmem:[#allocation2 + $0xa8] sm:$0xff] }
 0x17e   : > { %v3759_v61 = vsub.f32 %v1992_v11, %v3756_v57  ;;  %v3762_v3 = vsub.f32 %v1993_v50, %v3756_v57  ;;  %v3765_v22 = vsub.f32 %v1994_v56, %v3756_v57  ;;  %v3768_v23 = vsub.f32 %v1995_v31, %v3756_v57 }
 0x17f   : > { %v3771_v4 = vsub.f32 %v1996_v58, %v3756_v57  ;;  %v3774_v35 = vsub.f32 %v1997_v52, %v3756_v57  ;;  %v3792_v40 = vsub.f32 %v1900_v28, %v3756_v57  ;;  %v3795_v14 = vsub.f32 %v1901_v30, %v3756_v57 }
 0x180   : > { %v2008_v12 = vmul.f32 %v3759_v61, %v3759_v61  ;;  %v2009_v9 = vmul.f32 %v3762_v3, %v3762_v3  ;;  %v2010_v38 = vmul.f32 %v3765_v22, %v3765_v22  ;;  %v2011_v54 = vmul.f32 %v3768_v23, %v3768_v23 }
 0x181   : > { %v2012_v39 = vmul.f32 %v3771_v4, %v3771_v4  ;;  %v2013_v1 = vmul.f32 %v3774_v35, %v3774_v35  ;;  %v3798_v60 = vsub.f32 %v1902_v41, %v3756_v57  ;;  %v3801_v36 = vsub.f32 %v1903_v8, %v3756_v57 }
 0x182   : > { %v2016_v27 = vsel %vm434_vm1, %v2008_v12, 0.0  ;;  %v2017_v59 = vsel %vm434_vm1, %v2009_v9, 0.0  ;;  %v2019_v33 = vsel %vm434_vm1, %v2010_v38, 0.0  ;;  %v2021_v24 = vsel %vm434_vm1, %v2011_v54, 0.0  ;;  %v1860_v38 = vld [vmem:[#allocation2 + $0x30] sm:$0xff] }
 0x183   : > { %v2018_v18 = vadd.f32 %v2017_v59, %v2016_v27  ;;  %v2023_v17 = vsel %vm434_vm1, %v2012_v39, 0.0  ;;  %v2025_v47 = vsel %vm434_vm1, %v2013_v1, 0.0  ;;  %v3807_v44 = vsub.f32 %v1904_v6, %v3756_v57  ;;  %v1952_v54 = vld [vmem:[#allocation2 + $0xb0] sm:$0xff]  ;;  %v1861_v39 = vld [vmem:[#allocation2 + $0x38] sm:$0xff] }
 0x184   : > { %v3810_v42 = vsub.f32 %v1905_v26, %v3756_v57  ;;  %v3813_v43 = vsub.f32 %v1906_v5, %v3756_v57  ;;  %v3816_v53 = vsub.f32 %v1854_v15, %v3756_v57  ;;  %v3819_v2 = vsub.f32 %v1907_v37, %v3756_v57  ;;  %v1999_v6 = vld [vmem:[#allocation2 + $0xf8] sm:$0xff] }
 0x185   : > { %v2020_v21 = vadd.f32 %v2019_v33, %v2018_v18  ;;  %v3822_v46 = vsub.f32 %v1855_v51, %v3756_v57  ;;  %v3825_v20 = vsub.f32 %v1856_v63, %v3756_v57  ;;  %v3828_v45 = vsub.f32 %v1857_v48, %v3756_v57  ;;  %v1998_v33 = vld [vmem:[#allocation2 + $0xf0] sm:$0xff] }
 0x186   : > { %v3831_v34 = vsub.f32 %v1946_v19, %v3756_v57  ;;  %v3834_v7 = vsub.f32 %v1947_v13, %v3756_v57  ;;  %v3837_v10 = vsub.f32 %v1948_v49, %v3756_v57  ;;  %v3840_v29 = vsub.f32 %v1858_v62, %v3756_v57 }
 0x187   : > { %v2022_v25 = vadd.f32 %v2021_v24, %v2020_v21  ;;  %v3843_v56 = vsub.f32 %v1859_v0, %v3756_v57  ;;  %v1870_v11 = vmul.f32 %v3816_v53, %v3816_v53  ;;  %v1871_v31 = vmul.f32 %v3822_v46, %v3822_v46 }
 0x188   : > { %v1872_v50 = vmul.f32 %v3825_v20, %v3825_v20  ;;  %v3852_v52 = vsub.f32 %v1949_v32, %v3756_v57  ;;  %v3855_v12 = vsub.f32 %v1950_v16, %v3756_v57  ;;  %v3858_v9 = vsub.f32 %v1951_v55, %v3756_v57 }
 0x189   : > { %v2024_v58 = vadd.f32 %v2023_v17, %v2022_v25  ;;  %v3861_v1 = vsub.f32 %v1860_v38, %v3756_v57  ;;  %v1873_v27 = vmul.f32 %v3828_v45, %v3828_v45  ;;  %v1878_v59 = vsel %vm434_vm1, %v1870_v11, 0.0 }
 0x18a   : > { %v1879_v28 = vsel %vm434_vm1, %v1871_v31, 0.0  ;;  %v3868_v18 = vsub.f32 %v1952_v54, %v3756_v57  ;;  %v3871_v41 = vsub.f32 %v1861_v39, %v3756_v57  ;;  %v1874_v8 = vmul.f32 %v3840_v29, %v3840_v29 }
 0x18b   : > { %v1880_v30 = vadd.f32 %v1879_v28, %v1878_v59  ;;  %v1875_v21 = vmul.f32 %v3843_v56, %v3843_v56  ;;  %v1881_v15 = vsel %vm434_vm1, %v1872_v50, 0.0  ;;  %v1916_v63 = vmul.f32 %v3792_v40, %v3792_v40 }
 0x18c   : > { %v1917_v5 = vmul.f32 %v3795_v14, %v3795_v14  ;;  %v3883_v26 = vsub.f32 %v1998_v33, %v3756_v57  ;;  %v3886_v24 = vsub.f32 %v1999_v6, %v3756_v57  ;;  %v1918_v48 = vmul.f32 %v3798_v60, %v3798_v60 }
 0x18d   : > { %v1882_v17 = vadd.f32 %v1881_v15, %v1880_v30  ;;  %v2026_v37 = vadd.f32 %v2025_v47, %v2024_v58  ;;  %v1876_v25 = vmul.f32 %v3861_v1, %v3861_v1  ;;  %v1883_v51 = vsel %vm434_vm1, %v1873_v27, 0.0 }
 0x18e   : > { %v1924_v62 = vsel %vm434_vm1, %v1916_v63, 0.0  ;;  %v1877_v49 = vmul.f32 %v3871_v41, %v3871_v41  ;;  %v1919_v13 = vmul.f32 %v3801_v36, %v3801_v36  ;;  %v1925_v0 = vsel %vm434_vm1, %v1917_v5, 0.0 }
 0x18f   : > { %v1884_v19 = vadd.f32 %v1883_v51, %v1882_v17  ;;  %v1885_v32 = vsel %vm434_vm1, %v1874_v8, 0.0  ;;  %v1887_v47 = vsel %vm434_vm1, %v1875_v21, 0.0  ;;  %v1920_v16 = vmul.f32 %v3807_v44, %v3807_v44 }
 0x190   : > { %v1926_v55 = vadd.f32 %v1925_v0, %v1924_v62  ;;  %v1927_v31 = vsel %vm434_vm1, %v1918_v48, 0.0  ;;  %v1962_v50 = vmul.f32 %v3831_v34, %v3831_v34  ;;  %v1963_v58 = vmul.f32 %v3834_v7, %v3834_v7 }
 0x191   : > { %v1886_v11 = vadd.f32 %v1885_v32, %v1884_v19  ;;  %v1889_v38 = vsel %vm434_vm1, %v1876_v25, 0.0  ;;  %v1921_v54 = vmul.f32 %v3810_v42, %v3810_v42  ;;  %v1964_v27 = vmul.f32 %v3837_v10, %v3837_v10  ;;  %v1953_v19 = vld [vmem:[#allocation2 + $0xb8] sm:$0xff] }
 0x192   : > { %v1928_v39 = vadd.f32 %v1927_v31, %v1926_v55  ;;  %v1891_v28 = vsel %vm434_vm1, %v1877_v49, 0.0  ;;  %v1922_v8 = vmul.f32 %v3813_v43, %v3813_v43  ;;  %v1929_v30 = vsel %vm434_vm1, %v1919_v13, 0.0 }
 0x193   : > { %v1888_v59 = vadd.f32 %v1887_v47, %v1886_v11  ;;  %v1965_v6 = vmul.f32 %v3852_v52, %v3852_v52  ;;  %v1970_v21 = vsel %vm434_vm1, %v1962_v50, 0.0  ;;  %v1971_v15 = vsel %vm434_vm1, %v1963_v58, 0.0 }
 0x194   : > { %v1930_v33 = vadd.f32 %v1929_v30, %v1928_v39  ;;  %v1923_v5 = vmul.f32 %v3819_v2, %v3819_v2  ;;  %v1931_v17 = vsel %vm434_vm1, %v1920_v16, 0.0  ;;  %v1972_v48 = vadd.f32 %v1971_v15, %v1970_v21 }
 0x195   : > { %v1890_v63 = vadd.f32 %v1889_v38, %v1888_v59  ;;  %v1933_v51 = vsel %vm434_vm1, %v1921_v54, 0.0  ;;  %v1966_v62 = vmul.f32 %v3855_v12, %v3855_v12  ;;  %v1973_v49 = vsel %vm434_vm1, %v1964_v27, 0.0 }
 0x196   : > { %v1932_v25 = vadd.f32 %v1931_v17, %v1930_v33  ;;  %v1974_v0 = vadd.f32 %v1973_v49, %v1972_v48  ;;  %v2014_v32 = vmul.f32 %v3883_v26, %v3883_v26  ;;  %v2015_v47 = vmul.f32 %v3886_v24, %v3886_v24 }
 0x197   : > { %v1892_v13 = vadd.f32 %v1891_v28, %v1890_v63  ;;  %v3933_v16 = vsub.f32 %v1953_v19, %v3756_v57  ;;  %v1967_v11 = vmul.f32 %v3858_v9, %v3858_v9  ;;  %v1975_v31 = vsel %vm434_vm1, %v1965_v6, 0.0 }
 0x198   : > { %v1934_v55 = vadd.f32 %v1933_v51, %v1932_v25  ;;  %v1935_v58 = vsel %vm434_vm1, %v1922_v8, 0.0  ;;  %v1976_v38 = vadd.f32 %v1975_v31, %v1974_v0  ;;  %v2027_v54 = vsel %vm434_vm1, %v2014_v32, 0.0 }
 0x199   : > { %v1893_v50 = vrot.slane %v1892_v13, 4  ;;  %v1968_v27 = vmul.f32 %v3868_v18, %v3868_v18  ;;  %v1977_v59 = vsel %vm434_vm1, %v1966_v62, 0.0  ;;  %v2028_v57 = vadd.f32 %v2027_v54, %v2026_v37 }
 0x19a   : > { %v1936_v39 = vadd.f32 %v1935_v58, %v1934_v55  ;;  %v1937_v30 = vsel %vm434_vm1, %v1923_v5, 0.0  ;;  %v1978_v33 = vadd.f32 %v1977_v59, %v1976_v38  ;;  %v2029_v21 = vsel %vm434_vm1, %v2015_v47, 0.0 }
 0x19b   : > { %v1894_v28 = vadd.f32 %v1893_v50, %v1892_v13  ;;  %v1969_v8 = vmul.f32 %v3933_v16, %v3933_v16  ;;  %v1979_v15 = vsel %vm434_vm1, %v1967_v11, 0.0  ;;  %v2030_v63 = vadd.f32 %v2029_v21, %v2028_v57 }
 0x19c   : > { %v1938_v6 = vadd.f32 %v1937_v30, %v1936_v39  ;;  %v1980_v48 = vadd.f32 %v1979_v15, %v1978_v33  ;;  %v1981_v51 = vsel %vm434_vm1, %v1968_v27, 0.0 }
 0x19d   : > { %v1895_v17 = vrot.slane %v1894_v28, 2  ;;  %v2031_v62 = vrot.slane %v2030_v63, 4  ;;  %v1983_v5 = vsel %vm434_vm1, %v1969_v8, 0.0 }
 0x19e   : > { %v1939_v25 = vrot.slane %v1938_v6, 4  ;;  %v1982_v49 = vadd.f32 %v1981_v51, %v1980_v48 }
 0x19f   : > { %v1896_v37 = vadd.f32 %v1895_v17, %v1894_v28  ;;  %v2032_v13 = vadd.f32 %v2031_v62, %v2030_v63 }
 0x1a0   : > { %v1940_v19 = vadd.f32 %v1939_v25, %v1938_v6  ;;  %v1984_v0 = vadd.f32 %v1983_v5, %v1982_v49  ;;  %v2158_v5 = vpop.permute.xlu1 %2157 }
 0x1a1   : > { %v1897_v47 = vrot.slane %v1896_v37, 1  ;;  %v2033_v31 = vrot.slane %v2032_v13, 2 }
 0x1a2   : > { %v1941_v32 = vrot.slane %v1940_v19, 2  ;;  %v1985_v55 = vrot.slane %v1984_v0, 4 }
 0x1a3   : > { %v1898_v38 = vadd.f32 %v1897_v47, %v1896_v37  ;;  %v2034_v39 = vadd.f32 %v2033_v31, %v2032_v13 }
 0x1a4   : > { %v1942_v50 = vadd.f32 %v1941_v32, %v1940_v19  ;;  %v1986_v11 = vadd.f32 %v1985_v55, %v1984_v0 }
 0x1a5   : > { %v2035_v30 = vrot.slane %v2034_v39, 1 }
 0x1a6   : > { %v1943_v58 = vrot.slane %v1942_v50, 1  ;;  %v1987_v54 = vrot.slane %v1986_v11, 2 }
 0x1a7   : > { %v2036_v6 = vadd.f32 %v2035_v30, %v2034_v39 }
 0x1a8   : > { %v1944_v59 = vadd.f32 %v1943_v58, %v1942_v50  ;;  %v1988_v27 = vadd.f32 %v1987_v54, %v1986_v11 }
 0x1aa   : > { %v1945_v57 = vadd.f32 %v1944_v59, %v1898_v38  ;;  %v1989_v28 = vrot.slane %v1988_v27, 1 }
 0x1ac   : > { %v1990_v33 = vadd.f32 %v1989_v28, %v1988_v27 }
 0x1ae   : > { %v1991_v21 = vadd.f32 %v1990_v33, %v1945_v57 }
 0x1b0   : > { %v2037_v8 = vadd.f32 %v2036_v6, %v1991_v21 }
 0x1b2   : > { %v2038_v15 = vmul.f32 0.00390625, %v2037_v8 }
 0x1b4   : > { %v2039_v63 = vadd.f32 1e-05, %v2038_v15 }
 0x1b6   : > { %3076 = vrsqrt.f32 %v2039_v63 }
 0x1c3   : > { %v3950_v17 = vpop.eup %3076 }
 0x1c4   : > { %v2051_v48 = vmul.f32 %v3950_v17, %v3825_v20  ;;  %v3956_v25 = vmul.f32 %v3950_v17, %v3816_v53  ;;  %v3960_v51 = vmul.f32 %v3950_v17, %v3828_v45  ;;  %v3964_v62 = vmul.f32 %v3950_v17, %v3822_v46 }
 0x1c5   : > { %v3968_v37 = vmul.f32 %v3950_v17, %v3843_v56  ;;  %v3972_v49 = vmul.f32 %v3950_v17, %v3840_v29  ;;  %v3976_v53 = vmul.f32 %v3950_v17, %v3871_v41  ;;  %v3980_v20 = vmul.f32 %v3950_v17, %v3861_v1 }
 0x1c6   : > { %vm2059_vm8 = vcmp.ge.f32.partialorder %v2051_v48, 0.0  ;;  %v2067_v45 = vmul.f32 0.01, %v2051_v48  ;;  %v3987_v29 = vmul.f32 %v3950_v17, %v3834_v7  ;;  %v3991_v41 = vmul.f32 %v3950_v17, %v3831_v34 }
 0x1c7   : > { %v3995_v1 = vmul.f32 %v3950_v17, %v3852_v52  ;;  %v3999_v13 = vmul.f32 %v3950_v17, %v3837_v10  ;;  %v2090_v0 = vmul.f32 %v3950_v17, %v3795_v14  ;;  %v2089_v32 = vmul.f32 %v3950_v17, %v3792_v40 }
 0x1c8   : > { %v2075_v46 = vsel %vm2059_vm8, %v2051_v48, %v2067_v45  ;;  %v2092_v55 = vmul.f32 %v3950_v17, %v3801_v36  ;;  %v2091_v52 = vmul.f32 %v3950_v17, %v3798_v60  ;;  %v2094_v50 = vmul.f32 %v3950_v17, %v3810_v42 }
 0x1c9   : > { %v2083_v19 = vpack.c.bf16 %v2075_v46, %v2075_v46  ;;  %vm2098_vm9 = vcmp.ge.f32.partialorder %v2090_v0, 0.0  ;;  %v2106_v7 = vmul.f32 0.01, %v2090_v0  ;;  %vm2097_vm10 = vcmp.ge.f32.partialorder %v2089_v32, 0.0 }
 0x1ca   : > { %v2105_v47 = vmul.f32 0.01, %v2089_v32  ;;  %v2093_v14 = vmul.f32 %v3950_v17, %v3807_v44  ;;  %vm2100_vm11 = vcmp.ge.f32.partialorder %v2092_v55, 0.0  ;;  %v2108_v11 = vmul.f32 0.01, %v2092_v55 }
 0x1cb   : > { %v3983_v56 = vsel %vm434_vm1, %v2083_v19, %v2158_v5  ;;  %v2114_v34 = vsel %vm2098_vm9, %v2090_v0, %v2106_v7  ;;  %vm2099_vm12 = vcmp.ge.f32.partialorder %v2091_v52, 0.0  ;;  %v2107_v58 = vmul.f32 0.01, %v2091_v52 }
 0x1cc   : > { %v2122_v31 = vpack.c.bf16 %v2114_v34, %v2114_v34  ;;  %v2113_v10 = vsel %vm2097_vm10, %v2089_v32, %v2105_v47  ;;  %vm2102_vm13 = vcmp.ge.f32.partialorder %v2094_v50, 0.0  ;;  %v2110_v36 = vmul.f32 0.01, %v2094_v50 }
 0x1cd   : > { %v2121_v40 = vpack.c.bf16 %v2113_v10, %v2113_v10  ;;  %v2116_v60 = vsel %vm2100_vm11, %v2092_v55, %v2108_v11  ;;  %vm2101_vm14 = vcmp.ge.f32.partialorder %v2093_v14, 0.0  ;;  %v2109_v38 = vmul.f32 0.01, %v2093_v14 }
 0x1ce   : > { %2179 = vrot.lane.b32.xlu1 %v2122_v31, %s3089_s30  ;;  %v2096_v42 = vmul.f32 %v3950_v17, %v3819_v2  ;;  %v2124_v54 = vpack.c.bf16 %v2116_v60, %v2116_v60  ;;  %v2115_v39 = vsel %vm2099_vm12, %v2091_v52, %v2107_v58  ;;  %v2095_v44 = vmul.f32 %v3950_v17, %v3813_v43 }
 0x1cf   : > { %2177 = vrot.lane.b32.xlu0 %v2121_v40, %s3089_s30  ;;  %v2123_v59 = vpack.c.bf16 %v2115_v39, %v2115_v39  ;;  %v2118_v27 = vsel %vm2102_vm13, %v2094_v50, %v2110_v36  ;;  %v2117_v57 = vsel %vm2101_vm14, %v2093_v14, %v2109_v38  ;;  %v2366_v33 = vmul.f32 %v3950_v17, %v3762_v3  ;;  %v2154_v38 = vpop.permute.xlu0 %2153  ;;  %v3078_v39 = vld [vmem:[%s3571_s28 + $0x3c] ss:$0 sps:$4 sm:$0xff]  }
 0x1d0   : > { %vm2104_vm15 = vcmp.ge.f32.partialorder %v2096_v42, 0.0  ;;  %v2112_v28 = vmul.f32 0.01, %v2096_v42  ;;  %v2111_v30 = vmul.f32 0.01, %v2095_v44  ;;  %vm2103_vm0 = vcmp.ge.f32.partialorder %v2095_v44, 0.0 }
 0x1d1   : > { %v2365_v2 = vmul.f32 %v3950_v17, %v3759_v61  ;;  %v2126_v21 = vpack.c.bf16 %v2118_v27, %v2118_v27  ;;  %v2125_v6 = vpack.c.bf16 %v2117_v57, %v2117_v57  ;;  %v2382_v8 = vmul.f32 0.01, %v2366_v33 }
 0x1d2   : > { %2183 = vrot.lane.b32.xlu1 %v2124_v54, %s3089_s30  ;;  %v2120_v43 = vsel %vm2104_vm15, %v2096_v42, %v2112_v28  ;;  %v2368_v15 = vmul.f32 %v3950_v17, %v3768_v23  ;;  %v2119_v63 = vsel %vm2103_vm0, %v2095_v44, %v2111_v30  ;;  %vm2374_vm2 = vcmp.ge.f32.partialorder %v2366_v33, 0.0  ;;  %v4049_v54 = vpop.permute.xlu1 %2159 }
 0x1d3   : > { %2181 = vrot.lane.b32.xlu0 %v2123_v59, %s3089_s30  ;;  %v2381_v48 = vmul.f32 0.01, %v2365_v2  ;;  %v2367_v45 = vmul.f32 %v3950_v17, %v3765_v22  ;;  %vm2373_vm3 = vcmp.ge.f32.partialorder %v2365_v2, 0.0  ;;  %v2128_v3 = vpack.c.bf16 %v2120_v43, %v2120_v43  ;;  %v2156_v44 = vpop.permute.xlu0 %2155  ;;  %v3079_v59 = vld [vmem:[%s3571_s28 + $0x34] ss:$0 sps:$4 sm:$0xff]  }
 0x1d4   : > { %v2127_v61 = vpack.c.bf16 %v2119_v63, %v2119_v63  ;;  %v2390_v46 = vsel %vm2374_vm2, %v2366_v33, %v2382_v8  ;;  %v2384_v19 = vmul.f32 0.01, %v2368_v15  ;;  %v2370_v5 = vmul.f32 %v3950_v17, %v3774_v35 }
 0x1d5   : > { %v2389_v23 = vsel %vm2373_vm3, %v2365_v2, %v2381_v48  ;;  %vm2376_vm4 = vcmp.ge.f32.partialorder %v2368_v15, 0.0  ;;  %v2383_v0 = vmul.f32 0.01, %v2367_v45  ;;  %v2369_v32 = vmul.f32 %v3950_v17, %v3771_v4 }
 0x1d6   : > { %2187 = vrot.lane.b32.xlu1 %v2126_v21, %s3089_s30  ;;  %vm2375_vm5 = vcmp.ge.f32.partialorder %v2367_v45, 0.0  ;;  %v2398_v22 = vpack.c.bf16 %v2390_v46, %v2390_v46  ;;  %v2397_v7 = vpack.c.bf16 %v2389_v23, %v2389_v23  ;;  %v2392_v47 = vsel %vm2376_vm4, %v2368_v15, %v2384_v19  ;;  %v4055_v27 = vpop.permute.xlu1 %2163 }
 0x1d7   : > { %2185 = vrot.lane.b32.xlu0 %v2125_v6, %s3089_s30  ;;  %v2386_v34 = vmul.f32 0.01, %v2370_v5  ;;  %v2372_v55 = vmul.f32 %v3950_v17, %v3886_v24  ;;  %v2391_v35 = vsel %vm2375_vm5, %v2367_v45, %v2383_v0  ;;  %vm2378_vm6 = vcmp.ge.f32.partialorder %v2370_v5, 0.0  ;;  %v4057_v57 = vpop.permute.xlu0 %2161 }
 0x1d8   : > { %v2385_v52 = vmul.f32 0.01, %v2369_v32  ;;  %v2371_v31 = vmul.f32 %v3950_v17, %v3883_v26  ;;  %vm2377_vm7 = vcmp.ge.f32.partialorder %v2369_v32, 0.0  ;;  %v2400_v4 = vpack.c.bf16 %v2392_v47, %v2392_v47 }
 0x1d9   : > { %v2399_v10 = vpack.c.bf16 %v2391_v35, %v2391_v35  ;;  %v2394_v50 = vsel %vm2378_vm6, %v2370_v5, %v2386_v34  ;;  %v2388_v14 = vmul.f32 0.01, %v2372_v55  ;;  %vm2380_vm8 = vcmp.ge.f32.partialorder %v2372_v55, 0.0 }
 0x1da   : > { %2191 = vrot.lane.b32.xlu1 %v2128_v3, %s3089_s30  ;;  %v2393_v40 = vsel %vm2377_vm7, %v2369_v32, %v2385_v52  ;;  %v2387_v24 = vmul.f32 0.01, %v2371_v31  ;;  %vm2379_vm9 = vcmp.ge.f32.partialorder %v2371_v31, 0.0  ;;  %v2402_v11 = vpack.c.bf16 %v2394_v50, %v2394_v50  ;;  %v4059_v28 = vpop.permute.xlu1 %2167 }
 0x1db   : > { %2189 = vrot.lane.b32.xlu0 %v2127_v61, %s3089_s30  ;;  %v2401_v58 = vpack.c.bf16 %v2393_v40, %v2393_v40  ;;  %v2396_v26 = vsel %vm2380_vm8, %v2372_v55, %v2388_v14  ;;  %v4061_v30 = vpop.permute.xlu0 %2165  ;;  %v2065_v34 = vmul.f32 0.01, %v3956_v25  ;;  %vm2058_vm10 = vcmp.ge.f32.partialorder %v3964_v62, 0.0 }
 0x1dc   : > { %v2395_v36 = vsel %vm2379_vm9, %v2371_v31, %v2387_v24  ;;  %v2404_v60 = vpack.c.bf16 %v2396_v26, %v2396_v26  ;;  %vm2057_vm11 = vcmp.ge.f32.partialorder %v3956_v25, 0.0  ;;  %v2068_v55 = vmul.f32 0.01, %v3960_v51 }
 0x1dd   : > { %v2403_v42 = vpack.c.bf16 %v2395_v36, %v2395_v36  ;;  %vm2060_vm12 = vcmp.ge.f32.partialorder %v3960_v51, 0.0  ;;  %v2073_v52 = vsel %vm2057_vm11, %v3956_v25, %v2065_v34  ;;  %v2070_v14 = vmul.f32 0.01, %v3968_v37 }
 0x1de   : > { %2455 = vrot.lane.b32.xlu1 %v2398_v22, %s3089_s30  ;;  %v2196_v33 = vpop.permute.xlu1 %2195  ;;  %v2069_v40 = vmul.f32 0.01, %v3972_v49  ;;  %v2081_v24 = vpack.c.bf16 %v2073_v52, %v2073_v52  ;;  %vm2062_vm13 = vcmp.ge.f32.partialorder %v3968_v37, 0.0  ;;  %vm2061_vm14 = vcmp.ge.f32.partialorder %v3972_v49, 0.0 }
 0x1df   : > { %2453 = vrot.lane.b32.xlu0 %v2397_v7, %s3089_s30  ;;  %v2194_v2 = vpop.permute.xlu0 %2193  ;;  %v2066_v7 = vmul.f32 0.01, %v3964_v62  ;;  %vm2233_vm15 = vcmask 130048   ;;  %vm2250_vm0 = vcmask 195584   ;;  %vm2275_vm2 = vcmask 257024  }
 0x1e0   : > { %v2211_v36 = vsel %vm434_vm1, %v2081_v24, %v2154_v38  ;;  %vm2064_vm3 = vcmp.ge.f32.partialorder %v3976_v53, 0.0  ;;  %vm2063_vm4 = vcmp.ge.f32.partialorder %v3980_v20, 0.0  ;;  %vm2318_vm5 = vcmp.ge.f32.partialorder %v3987_v29, 0.0 }
 0x1e1   : > { %v2074_v35 = vsel %vm2058_vm10, %v3964_v62, %v2066_v7  ;;  %v2325_v52 = vmul.f32 0.01, %v3991_v41  ;;  %vm2317_vm6 = vcmp.ge.f32.partialorder %v3991_v41, 0.0  ;;  %vm2320_vm7 = vcmp.ge.f32.partialorder %v3995_v1, 0.0 }
 0x1e2   : > { %2459 = vrot.lane.b32.xlu1 %v2400_v4, %s3089_s30  ;;  %v4063_v21 = vpop.permute.xlu1 %2431  ;;  %v2082_v50 = vpack.c.bf16 %v2074_v35, %v2074_v35  ;;  %vm2319_vm8 = vcmp.ge.f32.partialorder %v3999_v13, 0.0 }
 0x1e3   : > { %2457 = vrot.lane.b32.xlu0 %v2399_v10, %s3089_s30  ;;  %v4065_v6 = vpop.permute.xlu0 %2429  ;;  %v2076_v10 = vsel %vm2060_vm12, %v3960_v51, %v2068_v55  ;;  %v2078_v51 = vsel %vm2062_vm13, %v3968_v37, %v2070_v14  ;;  %v2326_v55 = vmul.f32 0.01, %v3987_v29 }
 0x1e4   : > { %v2084_v62 = vpack.c.bf16 %v2076_v10, %v2076_v10  ;;  %v2214_v25 = vsel %vm434_vm1, %v2082_v50, %v2156_v44 }
 0x1e6   : > { %2463 = vrot.lane.b32.xlu1 %v2402_v11, %s3089_s30  ;;  %v4067_v43 = vpop.permute.xlu1 %2435  ;;  %v2077_v11 = vsel %vm2061_vm14, %v3972_v49, %v2069_v40  ;;  %v2086_v49 = vpack.c.bf16 %v2078_v51, %v2078_v51  ;;  %v2220_v38 = vsel %vm434_vm1, %v2084_v62, %v4049_v54  ;;  %v2334_v62 = vsel %vm2318_vm5, %v3987_v29, %v2326_v55 }
 0x1e7   : > { %2461 = vrot.lane.b32.xlu0 %v2401_v58, %s3089_s30  ;;  %v4069_v8 = vpop.permute.xlu0 %2433  ;;  %v2072_v58 = vmul.f32 0.01, %v3976_v53  ;;  %v2313_v29 = vmul.f32 %v3950_v17, %v3855_v12  ;;  %v2315_v55 = vmul.f32 %v3950_v17, %v3868_v18 }
 0x1e8   : > { %v2226_v50 = vsel %vm434_vm1, %v2086_v49, %v4055_v27 }
 0x1e9   : > { %v2080_v34 = vsel %vm2064_vm3, %v3976_v53, %v2072_v58  ;;  %vm2321_vm10 = vcmp.ge.f32.partialorder %v2313_v29, 0.0  ;;  %vm2323_vm12 = vcmp.ge.f32.partialorder %v2315_v55, 0.0 }
 0x1ea   : > { %2467 = vrot.lane.b32.xlu1 %v2404_v60, %s3089_s30  ;;  %v4071_v15 = vpop.permute.xlu1 %2439  ;;  %v2071_v60 = vmul.f32 0.01, %v3980_v20  ;;  %v2088_v14 = vpack.c.bf16 %v2080_v34, %v2080_v34 }
 0x1eb   : > { %2465 = vrot.lane.b32.xlu0 %v2403_v42, %s3089_s30  ;;  %v4073_v63 = vpop.permute.xlu0 %2437 }
 0x1ee   : > { %2483 = vrot.lane.b32.xlu1 %v3078_v39, %s3089_s30  ;;  %v4075_v48 = vpop.permute.xlu1 %2443 }
 0x1ef   : > { %2481 = vrot.lane.b32.xlu0 %v3079_v59, %s3089_s30  ;;  %v4077_v45 = vpop.permute.xlu0 %2441  ;;  %v2085_v59 = vpack.c.bf16 %v2077_v11, %v2077_v11 }
 0x1f2   : > { %v2200_v3 = vpop.permute.xlu1 %2199 }
 0x1f3   : > { %v4079_v61 = vpop.permute.xlu0 %2197 }
 0x1f6   : > { %v4081_v46 = vpop.permute.xlu1 %2203 }
 0x1f7   : > { %v4083_v19 = vpop.permute.xlu0 %2201 }
 0x1fa   : > { %v4085_v5 = vpop.permute.xlu1 %2207 }
 0x1fb   : > { %v4087_v23 = vpop.permute.xlu0 %2205 }
 0x1fe   : > { %v4089_v0 = vpop.permute.xlu1 %2471 }
 0x1ff   : > { %v4091_v32 = vpop.permute.xlu0 %2469 }
 0x202   : > { %v4093_v22 = vpop.permute.xlu1 %2475 }
 0x203   : > { %v4096_v47 = vpop.permute.xlu0 %2473 }
 0x206   : > { %v4105_v31 = vpop.permute.xlu1 %2479 }
 0x207   : > { %v4107_v4 = vpop.permute.xlu0 %2477 }
 0x240   : > { %v2180_v26 = vpop.permute.xlu1 %2179 }
 0x241   : > { %v2237_v42 = vsel %vm2233_vm15, %v2214_v25, %v2180_v26  ;;  %v2178_v39 = vpop.permute.xlu0 %2177  ;;  %v2314_v25 = vmul.f32 %v3950_v17, %v3858_v9  ;;  %v2232_v9 = vsel %vm434_vm1, %v2088_v14, %v4059_v28 }
 0x242   : > { %v2255_v44 = vsel %vm2250_vm0, %v2237_v42, %v2196_v33  ;;  %v2235_v37 = vsel %vm2233_vm15, %v2211_v36, %v2178_v39  ;;  %v2079_v33 = vsel %vm2063_vm4, %v3980_v20, %v2071_v60  ;;  %v2223_v20 = vsel %vm434_vm1, %v2085_v59, %v4057_v57 }
 0x243   : > { %2277 = vst.msk [vmem:[%s4119_s6 + $0x8] sm:$0xf] %vm2275_vm2, %v2255_v44  ;;  %v2252_v7 = vsel %vm2250_vm0, %v2235_v37, %v2194_v2  ;;  %v2087_v24 = vpack.c.bf16 %v2079_v33, %v2079_v33  ;;  %v2333_v57 = vsel %vm2317_vm6, %v3991_v41, %v2325_v52  ;;  %v2342_v36 = vpack.c.bf16 %v2334_v62, %v2334_v62 }
 0x244   : > { %2276 = vst.msk [vmem:[%s4119_s6] sm:$0xf] %vm2275_vm2, %v2252_v7  ;;  %v2184_v35 = vpop.permute.xlu1 %2183  ;;  %v2341_v60 = vpack.c.bf16 %v2333_v57, %v2333_v57  ;;  %vm2322_vm9 = vcmp.ge.f32.partialorder %v2314_v25, 0.0  ;;  %v2329_v44 = vmul.f32 0.01, %v2313_v29  ;;  %v2316_v7 = vmul.f32 %v3950_v17, %v3933_v16 }
 0x245   : > { %v2241_v2 = vsel %vm2233_vm15, %v2220_v38, %v2184_v35  ;;  %v2182_v10 = vpop.permute.xlu0 %2181  ;;  %v2229_v26 = vsel %vm434_vm1, %v2087_v24, %v4061_v30 }
 0x246   : > { %v2261_v54 = vsel %vm2250_vm0, %v2241_v2, %v2200_v3  ;;  %v2239_v53 = vsel %vm2233_vm15, %v3983_v56, %v2182_v10  ;;  %v2328_v56 = vmul.f32 0.01, %v3995_v1  ;;  %v2327_v3 = vmul.f32 0.01, %v3999_v13 }
 0x247   : > { %2279 = vst.msk [vmem:[%s4119_s6 + $0x18] sm:$0xf] %vm2275_vm2, %v2261_v54  ;;  %v2258_v40 = vsel %vm2250_vm0, %v2239_v53, %v4079_v61  ;;  %v2487_v49 = vsel %vm434_vm1, %v2341_v60, %v4065_v6  ;;  %vm2324_vm11 = vcmp.ge.f32.partialorder %v2316_v7, 0.0  ;;  %v2332_v18 = vmul.f32 0.01, %v2316_v7 }
 0x248   : > { %2278 = vst.msk [vmem:[%s4119_s6 + $0x10] sm:$0xf] %vm2275_vm2, %v2258_v40  ;;  %v2188_v27 = vpop.permute.xlu1 %2187  ;;  %v2335_v42 = vsel %vm2319_vm8, %v3999_v13, %v2327_v3  ;;  %v2490_v13 = vsel %vm434_vm1, %v2342_v36, %v4063_v21  ;;  %v2337_v21 = vsel %vm2321_vm10, %v2313_v29, %v2329_v44  ;;  %v2331_v54 = vmul.f32 0.01, %v2315_v55 }
 0x249   : > { %v2245_v61 = vsel %vm2233_vm15, %v2226_v50, %v2188_v27  ;;  %v2186_v51 = vpop.permute.xlu0 %2185  ;;  %v2343_v38 = vpack.c.bf16 %v2335_v42, %v2335_v42  ;;  %v2345_v10 = vpack.c.bf16 %v2337_v21, %v2337_v21  ;;  %v2340_v14 = vsel %vm2324_vm11, %v2316_v7, %v2332_v18 }
 0x24a   : > { %v2267_v11 = vsel %vm2250_vm0, %v2245_v61, %v4081_v46  ;;  %v2243_v58 = vsel %vm2233_vm15, %v2223_v20, %v2186_v51  ;;  %v2336_v46 = vsel %vm2320_vm7, %v3995_v1, %v2328_v56  ;;  %v2339_v62 = vsel %vm2323_vm12, %v2315_v55, %v2331_v54 }
 0x24b   : > { %2281 = vst.msk [vmem:[%s4119_s6 + $0x28] sm:$0xf] %vm2275_vm2, %v2267_v11  ;;  %v2264_v41 = vsel %vm2250_vm0, %v2243_v58, %v4083_v19  ;;  %v2330_v19 = vmul.f32 0.01, %v2314_v25  ;;  %v2344_v59 = vpack.c.bf16 %v2336_v46, %v2336_v46  ;;  %v2499_v24 = vsel %vm434_vm1, %v2345_v10, %v4073_v63 }
 0x24c   : > { %2280 = vst.msk [vmem:[%s4119_s6 + $0x20] sm:$0xf] %vm2275_vm2, %v2264_v41  ;;  %v2192_v12 = vpop.permute.xlu1 %2191  ;;  %v2348_v57 = vpack.c.bf16 %v2340_v14, %v2340_v14  ;;  %v2347_v3 = vpack.c.bf16 %v2339_v62, %v2339_v62 }
 0x24d   : > { %v2249_v39 = vsel %vm2233_vm15, %v2232_v9, %v2192_v12  ;;  %v2190_v28 = vpop.permute.xlu0 %2189  ;;  %v2338_v34 = vsel %vm2322_vm9, %v2314_v25, %v2330_v19  ;;  %v2496_v52 = vsel %vm434_vm1, %v2344_v59, %v4067_v43 }
 0x24e   : > { %v2273_v30 = vsel %vm2250_vm0, %v2249_v39, %v4085_v5  ;;  %v2247_v37 = vsel %vm2233_vm15, %v2229_v26, %v2190_v28  ;;  %v2346_v2 = vpack.c.bf16 %v2338_v34, %v2338_v34  ;;  %v2508_v61 = vsel %vm434_vm1, %v2348_v57, %v4075_v48 }
 0x24f   : > { %2283 = vst.msk [vmem:[%s4119_s6 + $0x38] sm:$0xf] %vm2275_vm2, %v2273_v30  ;;  %v2270_v1 = vsel %vm2250_vm0, %v2247_v37, %v4087_v23 }
 0x250   : > { %2282 = vst.msk [vmem:[%s4119_s6 + $0x30] sm:$0xf] %vm2275_vm2, %v2270_v1  ;;  %v2456_v5 = vpop.permute.xlu1 %2455 }
 0x251   : > { %v2512_v23 = vsel %vm2233_vm15, %v2490_v13, %v2456_v5  ;;  %v2454_v35 = vpop.permute.xlu0 %2453 }
 0x252   : > { %v2529_v6 = vsel %vm2250_vm0, %v2512_v23, %v4089_v0  ;;  %v2510_v33 = vsel %vm2233_vm15, %v2487_v49, %v2454_v35  ;;  %v2493_v0 = vsel %vm434_vm1, %v2343_v38, %v4069_v8  ;;  %v2502_v8 = vsel %vm434_vm1, %v2346_v2, %v4071_v15 }
 0x253   : > { %2773 = vst.msk [vmem:[%s4119_s6 + $0xc] sm:$0xf] %vm2275_vm2, %v2529_v6  ;;  %v2526_v16 = vsel %vm2250_vm0, %v2510_v33, %v4091_v32 }
 0x254   : > { %2772 = vst.msk [vmem:[%s4119_s6 + $0x4] sm:$0xf] %vm2275_vm2, %v2526_v16  ;;  %v2460_v17 = vpop.permute.xlu1 %2459 }
 0x255   : > { %v2516_v53 = vsel %vm2233_vm15, %v2496_v52, %v2460_v17  ;;  %v2458_v50 = vpop.permute.xlu0 %2457 }
 0x256   : > { %v2535_v43 = vsel %vm2250_vm0, %v2516_v53, %v4093_v22  ;;  %v2514_v32 = vsel %vm2233_vm15, %v2493_v0, %v2458_v50 }
 0x257   : > { %2775 = vst.msk [vmem:[%s4119_s6 + $0x1c] sm:$0xf] %vm2275_vm2, %v2535_v43  ;;  %v2532_v20 = vsel %vm2250_vm0, %v2514_v32, %v4096_v47 }
 0x258   : > { %2774 = vst.msk [vmem:[%s4119_s6 + $0x14] sm:$0xf] %vm2275_vm2, %v2532_v20  ;;  %v2464_v40 = vpop.permute.xlu1 %2463 }
 0x259   : > { %v2520_v22 = vsel %vm2233_vm15, %v2502_v8, %v2464_v40  ;;  %v2462_v56 = vpop.permute.xlu0 %2461 }
 0x25a   : > { %v2541_v27 = vsel %vm2250_vm0, %v2520_v22, %v4105_v31  ;;  %v2518_v47 = vsel %vm2233_vm15, %v2499_v24, %v2462_v56  ;;  %v2505_v31 = vsel %vm434_vm1, %v2347_v3, %v4077_v45 }
 0x25b   : > { %2777 = vst.msk [vmem:[%s4119_s6 + $0x2c] sm:$0xf] %vm2275_vm2, %v2541_v27  ;;  %v2538_v15 = vsel %vm2250_vm0, %v2518_v47, %v4107_v4 }
 0x25c   : > { %2776 = vst.msk [vmem:[%s4119_s6 + $0x24] sm:$0xf] %vm2275_vm2, %v2538_v15  ;;  %v2468_v63 = vpop.permute.xlu1 %2467 }
 0x25d   : > { %v2466_v25 = vpop.permute.xlu0 %2465  ;;  %v2524_v51 = vsel %vm2233_vm15, %v2508_v61, %v2468_v63 }
 0x25e   : > { %v2522_v11 = vsel %vm2233_vm15, %v2505_v31, %v2466_v25 }
 0x260   : > { %v2484_v29 = vpop.permute.xlu1 %2483 }
 0x261   : > { %v2547_v58 = vsel %vm2250_vm0, %v2524_v51, %v2484_v29  ;;  %v2482_v41 = vpop.permute.xlu0 %2481 }
 0x262   : > { %2779 = vst.msk [vmem:[%s4119_s6 + $0x3c] sm:$0xf] %vm2275_vm2, %v2547_v58  ;;  %v2544_v4 = vsel %vm2250_vm0, %v2522_v11, %v2482_v41 }
 0x263   : > { %2778 = vst.msk [vmem:[%s4119_s6 + $0x34] sm:$0xf] %vm2275_vm2, %v2544_v4 }
 0x264 PF: > { %s13_s12 = sadd.s32 1, %s3086_s12  }
 0x265   : > { %p10_p4 = scmp.ge.s32.totalorder %s13_s12, 4  }
 0x267   :  { %12 = sbr.rel (!%p10_p4) target bundleno = 1 (0x1), region = 73 }

</bundles_post_ra>
